<compile_context>
chip_gen: v7x
topology: tpu7x:2x2x1
jax: 0.10.0
libtpu: 0.0.40
codegen_flags: <defaults>
</compile_context>

<pallas_src>
import functools

import jax
import jax.numpy as jnp
from jax.experimental import pallas as pl
from jax.experimental.pallas import tpu as pltpu

_LANE = 128     # vreg lane width     -> last dim padded to a multiple of this
_SUBLANE = 8    # vreg sublane width  -> second-to-last dim padded to this


def _round_up(n, m):
    return ((n + m - 1) // m) * m


# --------------------------------------------------------------------------
# Fused kernel: the entire MLP forward in one body.
# refs = (x_ref, w_0, ..., w_{L-1}, b_all_ref, o_ref)
# --------------------------------------------------------------------------
def _fused_mlp_kernel(*refs, relu_flags, bias_slices, row_chunk):
    x_ref, o_ref = refs[0], refs[-1]
    b_ref = refs[-2]
    w_refs = refs[1:-2]

    def run_rows(rows):
        y = rows.astype(jnp.float32)
        # Static Python loop over layers (small, known trip count): each layer
        # is one MXU matmul + VPU bias-add (+ReLU); activations stay on-chip.
        for l, relu in enumerate(relu_flags):
            w = w_refs[l][...]
            off, dpo = bias_slices[l]                 # 128-aligned static slice
            y = jnp.dot(y.astype(w.dtype), w,
                        preferred_element_type=jnp.float32)
            y = y + b_ref[:, off:off + dpo].astype(jnp.float32)
            if relu:
                y = jnp.maximum(y, 0.0)
        return y

    tm = x_ref.shape[0]
    n_chunks = tm // row_chunk
    if n_chunks <= 1:
        o_ref[...] = run_rows(x_ref[...]).astype(o_ref.dtype)
    else:
        # Bound live activation ranges: only one row-chunk's layer chain is
        # live in vregs/VMEM at a time (keeps ld/st slots from binding at
        # large batch tiles).
        def body(c, carry):
            r = pl.multiple_of(c * row_chunk, row_chunk)
            o_ref[pl.ds(r, row_chunk), :] = run_rows(
                x_ref[pl.ds(r, row_chunk), :]).astype(o_ref.dtype)
            return carry

        jax.lax.fori_loop(0, n_chunks, body, 0, unroll=True)


# --------------------------------------------------------------------------
# One-time parameter preparation (padding hoisted OUT of the forward path).
# --------------------------------------------------------------------------
def prepare_params(params):
    """Pad weights/biases once and build static metadata.

    params: list of (w [Din, Dout], b [1, Dout], apply_relu) with chained dims.
    """
    relu_flags = tuple(bool(r) for (_, _, r) in params)
    din_true = params[0][0].shape[0]
    dout_true = params[-1][0].shape[1]

    din_pads = [_round_up(w.shape[0], _LANE) for (w, _, _) in params]
    dout_pads = [_round_up(w.shape[1], _LANE) for (w, _, _) in params]
    for l in range(len(params) - 1):
        assert params[l][0].shape[1] == params[l + 1][0].shape[0], "dims must chain"
        assert dout_pads[l] == din_pads[l + 1]

    w_padded, biases, bias_slices = [], [], []
    off = 0
    for (w, b, _), dpi, dpo in zip(params, din_pads, dout_pads):
        w_padded.append(jnp.pad(w, ((0, dpi - w.shape[0]), (0, dpo - w.shape[1]))))
        biases.append(jnp.pad(b, ((0, 0), (0, dpo - b.shape[1]))))
        bias_slices.append((off, dpo))
        off += dpo
    b_all = jnp.concatenate(biases, axis=1)     # (1, sum(Dout_pad)), lane-dense

    return dict(w_padded=w_padded, b_all=b_all, relu_flags=relu_flags,
                din_pads=tuple(din_pads), dout_pads=tuple(dout_pads),
                bias_slices=tuple(bias_slices),
                din_true=din_true, dout_true=dout_true)


# --------------------------------------------------------------------------
# Host-side forward: pad x, build specs, one pallas_call, slice the result.
# --------------------------------------------------------------------------
def autoencoder_forward(x, prepared, *, batch_tile=512):
    B, din0 = x.shape
    assert din0 == prepared["din_true"]
    din_pads, dout_pads = prepared["din_pads"], prepared["dout_pads"]
    w_padded, b_all = prepared["w_padded"], prepared["b_all"]

    # ---- batch tiling: large tiles (per-step-overhead / HBM bound), but keep
    # at least 2 tiles when the batch allows so both v7x TensorCores get work.
    b_pad = _round_up(B, _SUBLANE)
    tm = min(_round_up(batch_tile, _SUBLANE), b_pad)
    if b_pad // tm < 2 and b_pad >= 2 * _SUBLANE:
        tm = _round_up((b_pad + 1) // 2, _SUBLANE)
    b_pad = _round_up(b_pad, tm)            # grid divides evenly
    grid = (b_pad // tm,)
    row_chunk = 256 if tm % 256 == 0 else tm

    x_p = jnp.pad(x, ((0, b_pad - B), (0, din_pads[0] - din0)))

    # ---- VMEM budget --------------------------------------------------------
    x_item = jnp.dtype(x.dtype).itemsize
    p_item = jnp.dtype(w_padded[0].dtype).itemsize
    weight_bytes = (sum(int(w.size) for w in w_padded) + int(b_all.size)) * p_item
    act_bytes = 2 * tm * (din_pads[0] + dout_pads[-1]) * x_item   # double-buffered x/out
    # Two activations live per layer (Din_pad and Dout_pad, f32), bounded by chunk.
    inter_bytes = row_chunk * max(di + do for di, do in zip(din_pads, dout_pads)) * 4
    # Budget 2x weights so the double-buffered fallback path also fits.
    needed = 2 * weight_bytes + act_bytes + inter_bytes + (4 << 20)
    try:
        vmem_cap = pltpu.get_tpu_info().vmem_capacity_bytes
    except Exception:                       # pragma: no cover
        vmem_cap = 64 << 20                 # conservative (v7x per-TC)
    vmem_limit = int(min(max(needed, 32 << 20), int(vmem_cap * 0.9)))
    # TODO(synk): if the padded weight stack alone exceeds ~75% of VMEM (huge
    # N2D configs), tile the widest layer over an inner grid axis or
    # emit_pipeline its weights from HBM instead of relying on full residency.

    flops = 2 * b_pad * sum(di * do for di, do in zip(din_pads, dout_pads))
    bytes_accessed = (int(x_p.size) * x_item + weight_bytes
                      + b_pad * dout_pads[-1] * x_item)

    kernel = functools.partial(
        _fused_mlp_kernel, relu_flags=prepared["relu_flags"],
        bias_slices=prepared["bias_slices"], row_chunk=row_chunk)

    def _run(single_buffer_weights):
        wb_kw = ({"pipeline_mode": pl.Buffered(1)} if single_buffer_weights else {})
        in_specs = [pl.BlockSpec((tm, din_pads[0]), lambda i: (i, 0))]
        for dpi, dpo in zip(din_pads, dout_pads):
            # Constant block index -> weights resident in VMEM across batch tiles.
            in_specs.append(pl.BlockSpec((dpi, dpo), lambda i: (0, 0), **wb_kw))
        in_specs.append(pl.BlockSpec((1, b_all.shape[1]), lambda i: (0, 0), **wb_kw))
        out_specs = pl.BlockSpec((tm, dout_pads[-1]), lambda i: (i, 0))

        return pl.pallas_call(
            kernel,
            out_shape=jax.ShapeDtypeStruct((b_pad, dout_pads[-1]), x.dtype),
            grid_spec=pltpu.PrefetchScalarGridSpec(
                num_scalar_prefetch=0, grid=grid,
                in_specs=in_specs, out_specs=out_specs),
            compiler_params=pltpu.CompilerParams(
                dimension_semantics=("parallel",),   # split batch over the TCs
                vmem_limit_bytes=vmem_limit),
            cost_estimate=pl.CostEstimate(
                flops=flops, transcendentals=0, bytes_accessed=bytes_accessed),
        )(x_p, *w_padded, b_all)

    try:
        out_p = _run(True)      # single-buffered resident weights (pl.Buffered(1))
    except Exception:
        out_p = _run(False)     # fallback: default double-buffered pipelining

    return out_p[:B, :prepared["dout_true"]]


# --------------------------------------------------------------------------
# Parameter construction matching the PyTorch module's __init__ structure.
# --------------------------------------------------------------------------
def make_autoencoder_params(num_layers, key, encoders=False, dtype=jnp.float32):
    """Returns list of (w [Din, Dout], b [1, Dout], apply_relu) tuples.
    PyTorch-style init: U(-1/sqrt(fan_in), 1/sqrt(fan_in)) for W and b.
    Use dtype=jnp.bfloat16 in production to halve weight HBM/VMEM bytes; the
    kernel keeps f32 accumulation either way.
    """
    layer_dims = []  # (din, dout, relu)
    if encoders:
        for i in range(len(num_layers) - 2):
            layer_dims.append((num_layers[i], num_layers[i + 1], True))
        layer_dims.append((num_layers[-2], num_layers[-1], False))
    else:
        for i in range(len(num_layers) - 2):
            layer_dims.append((num_layers[i], num_layers[i + 1], True))
        layer_dims.append((num_layers[-2], num_layers[-1], False))
        for i in range(len(num_layers) - 1, 1, -1):
            layer_dims.append((num_layers[i], num_layers[i - 1], True))
        layer_dims.append((num_layers[1], num_layers[0], False))

    params = []
    for (din, dout, relu) in layer_dims:
        key, kw, kb = jax.random.split(key, 3)
        bound = 1.0 / float(jnp.sqrt(jnp.array(din, dtype=jnp.float32)))
        w = jax.random.uniform(kw, (din, dout), dtype=jnp.float32,
                               minval=-bound, maxval=bound).astype(dtype)
        b = jax.random.uniform(kb, (1, dout), dtype=jnp.float32,
                               minval=-bound, maxval=bound).astype(dtype)
        params.append((w, b, relu))
    return params


if __name__ == "__main__":
    key = jax.random.PRNGKey(0)
    key, kx, kp = jax.random.split(key, 3)

    # numLayers like the original N2D-style autoencoder (small for the demo).
    num_layers = [32, 64, 16, 8]
    batch = 16

    x = jax.random.normal(kx, (batch, num_layers[0]), dtype=jnp.float32)
    params = make_autoencoder_params(num_layers, kp, encoders=False,
                                     dtype=jnp.float32)
    prepared = prepare_params(params)     # pad weights/biases ONCE

    # Plain-JAX reference (same math) for a sanity check.
    def ref_forward(x, params):
        y = x
        for (w, b, relu) in params:
            y = jnp.dot(y, w) + b
            if relu:
                y = jnp.maximum(y, 0.0)
        return y

    out = autoencoder_forward(x, prepared)
    out = jax.block_until_ready(out)

    ref = ref_forward(x, params)
    assert out.shape == (batch, num_layers[0]), out.shape
    err = float(jnp.max(jnp.abs(out - ref)))
    assert err < 2e-2, err

    print("KERNEL_OK")
</pallas_src>

<mosaic_0001>
module attributes {stable_mosaic.version = 11 : i64} {
  func.func @_fused_mlp_kernel(%arg0: i32, %arg1: memref<8x128xf32, #tpu.memory_space<vmem>>, %arg2: memref<128x128xf32, #tpu.memory_space<vmem>>, %arg3: memref<128x128xf32, #tpu.memory_space<vmem>>, %arg4: memref<128x128xf32, #tpu.memory_space<vmem>>, %arg5: memref<128x128xf32, #tpu.memory_space<vmem>>, %arg6: memref<128x128xf32, #tpu.memory_space<vmem>>, %arg7: memref<128x128xf32, #tpu.memory_space<vmem>>, %arg8: memref<1x768xf32, #tpu.memory_space<vmem>>, %arg9: memref<8x128xf32, #tpu.memory_space<vmem>>) attributes {dimension_semantics = [#tpu.dimension_semantics<parallel>], iteration_bounds = array<i64: 2>, scalar_prefetch = 0 : i64, scratch_operands = 0 : i64, tpu.core_type = #tpu.core_type<tc>, window_params = [{transform_indices = @transform_0, window_bounds = array<i64: 8, 128>}, {pipeline_mode = #tpu.pipeline_mode<synchronous>, transform_indices = @transform_1, window_bounds = array<i64: 128, 128>}, {pipeline_mode = #tpu.pipeline_mode<synchronous>, transform_indices = @transform_2, window_bounds = array<i64: 128, 128>}, {pipeline_mode = #tpu.pipeline_mode<synchronous>, transform_indices = @transform_3, window_bounds = array<i64: 128, 128>}, {pipeline_mode = #tpu.pipeline_mode<synchronous>, transform_indices = @transform_4, window_bounds = array<i64: 128, 128>}, {pipeline_mode = #tpu.pipeline_mode<synchronous>, transform_indices = @transform_5, window_bounds = array<i64: 128, 128>}, {pipeline_mode = #tpu.pipeline_mode<synchronous>, transform_indices = @transform_6, window_bounds = array<i64: 128, 128>}, {pipeline_mode = #tpu.pipeline_mode<synchronous>, transform_indices = @transform_7, window_bounds = array<i64: 1, 768>}, {transform_indices = @transform_8, window_bounds = array<i64: 8, 128>}]} {
    %c0 = arith.constant 0 : index
    %c0_0 = arith.constant 0 : index
    %0 = vector.load %arg1[%c0, %c0_0] : memref<8x128xf32, #tpu.memory_space<vmem>>, vector<8x128xf32>
    %c0_1 = arith.constant 0 : index
    %c0_2 = arith.constant 0 : index
    %1 = vector.load %arg2[%c0_1, %c0_2] : memref<128x128xf32, #tpu.memory_space<vmem>>, vector<128x128xf32>
    %cst = arith.constant dense<0.000000e+00> : vector<8x128xf32>
    %2 = tpu.matmul %0, %1, %cst {dimension_numbers = #tpu.dot_dimension_numbers<[1], [0], [0], [1], [0, 0, 1, 1], [], []>} : vector<8x128xf32>, vector<128x128xf32>, vector<8x128xf32> -> vector<8x128xf32>
    %c0_3 = arith.constant 0 : index
    %c0_4 = arith.constant 0 : index
    %3 = vector.load %arg8[%c0_3, %c0_4] : memref<1x768xf32, #tpu.memory_space<vmem>>, vector<1x128xf32>
    %4 = vector.broadcast %3 : vector<1x128xf32> to vector<8x128xf32>
    %5 = arith.addf %2, %4 : vector<8x128xf32>
    %cst_5 = arith.constant 0.000000e+00 : f32
    %6 = vector.broadcast %cst_5 : f32 to vector<8x128xf32>
    %7 = arith.maximumf %5, %6 : vector<8x128xf32>
    %c0_6 = arith.constant 0 : index
    %c0_7 = arith.constant 0 : index
    %8 = vector.load %arg3[%c0_6, %c0_7] : memref<128x128xf32, #tpu.memory_space<vmem>>, vector<128x128xf32>
    %cst_8 = arith.constant dense<0.000000e+00> : vector<8x128xf32>
    %9 = tpu.matmul %7, %8, %cst_8 {dimension_numbers = #tpu.dot_dimension_numbers<[1], [0], [0], [1], [0, 0, 1, 1], [], []>} : vector<8x128xf32>, vector<128x128xf32>, vector<8x128xf32> -> vector<8x128xf32>
    %c0_9 = arith.constant 0 : index
    %c128 = arith.constant 128 : index
    %10 = vector.load %arg8[%c0_9, %c128] : memref<1x768xf32, #tpu.memory_space<vmem>>, vector<1x128xf32>
    %11 = vector.broadcast %10 : vector<1x128xf32> to vector<8x128xf32>
    %12 = arith.addf %9, %11 : vector<8x128xf32>
    %cst_10 = arith.constant 0.000000e+00 : f32
    %13 = vector.broadcast %cst_10 : f32 to vector<8x128xf32>
    %14 = arith.maximumf %12, %13 : vector<8x128xf32>
    %c0_11 = arith.constant 0 : index
    %c0_12 = arith.constant 0 : index
    %15 = vector.load %arg4[%c0_11, %c0_12] : memref<128x128xf32, #tpu.memory_space<vmem>>, vector<128x128xf32>
    %cst_13 = arith.constant dense<0.000000e+00> : vector<8x128xf32>
    %16 = tpu.matmul %14, %15, %cst_13 {dimension_numbers = #tpu.dot_dimension_numbers<[1], [0], [0], [1], [0, 0, 1, 1], [], []>} : vector<8x128xf32>, vector<128x128xf32>, vector<8x128xf32> -> vector<8x128xf32>
    %c0_14 = arith.constant 0 : index
    %c256 = arith.constant 256 : index
    %17 = vector.load %arg8[%c0_14, %c256] : memref<1x768xf32, #tpu.memory_space<vmem>>, vector<1x128xf32>
    %18 = vector.broadcast %17 : vector<1x128xf32> to vector<8x128xf32>
    %19 = arith.addf %16, %18 : vector<8x128xf32>
    %c0_15 = arith.constant 0 : index
    %c0_16 = arith.constant 0 : index
    %20 = vector.load %arg5[%c0_15, %c0_16] : memref<128x128xf32, #tpu.memory_space<vmem>>, vector<128x128xf32>
    %cst_17 = arith.constant dense<0.000000e+00> : vector<8x128xf32>
    %21 = tpu.matmul %19, %20, %cst_17 {dimension_numbers = #tpu.dot_dimension_numbers<[1], [0], [0], [1], [0, 0, 1, 1], [], []>} : vector<8x128xf32>, vector<128x128xf32>, vector<8x128xf32> -> vector<8x128xf32>
    %c0_18 = arith.constant 0 : index
    %c384 = arith.constant 384 : index
    %22 = vector.load %arg8[%c0_18, %c384] : memref<1x768xf32, #tpu.memory_space<vmem>>, vector<1x128xf32>
    %23 = vector.broadcast %22 : vector<1x128xf32> to vector<8x128xf32>
    %24 = arith.addf %21, %23 : vector<8x128xf32>
    %cst_19 = arith.constant 0.000000e+00 : f32
    %25 = vector.broadcast %cst_19 : f32 to vector<8x128xf32>
    %26 = arith.maximumf %24, %25 : vector<8x128xf32>
    %c0_20 = arith.constant 0 : index
    %c0_21 = arith.constant 0 : index
    %27 = vector.load %arg6[%c0_20, %c0_21] : memref<128x128xf32, #tpu.memory_space<vmem>>, vector<128x128xf32>
    %cst_22 = arith.constant dense<0.000000e+00> : vector<8x128xf32>
    %28 = tpu.matmul %26, %27, %cst_22 {dimension_numbers = #tpu.dot_dimension_numbers<[1], [0], [0], [1], [0, 0, 1, 1], [], []>} : vector<8x128xf32>, vector<128x128xf32>, vector<8x128xf32> -> vector<8x128xf32>
    %c0_23 = arith.constant 0 : index
    %c512 = arith.constant 512 : index
    %29 = vector.load %arg8[%c0_23, %c512] : memref<1x768xf32, #tpu.memory_space<vmem>>, vector<1x128xf32>
    %30 = vector.broadcast %29 : vector<1x128xf32> to vector<8x128xf32>
    %31 = arith.addf %28, %30 : vector<8x128xf32>
    %cst_24 = arith.constant 0.000000e+00 : f32
    %32 = vector.broadcast %cst_24 : f32 to vector<8x128xf32>
    %33 = arith.maximumf %31, %32 : vector<8x128xf32>
    %c0_25 = arith.constant 0 : index
    %c0_26 = arith.constant 0 : index
    %34 = vector.load %arg7[%c0_25, %c0_26] : memref<128x128xf32, #tpu.memory_space<vmem>>, vector<128x128xf32>
    %cst_27 = arith.constant dense<0.000000e+00> : vector<8x128xf32>
    %35 = tpu.matmul %33, %34, %cst_27 {dimension_numbers = #tpu.dot_dimension_numbers<[1], [0], [0], [1], [0, 0, 1, 1], [], []>} : vector<8x128xf32>, vector<128x128xf32>, vector<8x128xf32> -> vector<8x128xf32>
    %c0_28 = arith.constant 0 : index
    %c640 = arith.constant 640 : index
    %36 = vector.load %arg8[%c0_28, %c640] : memref<1x768xf32, #tpu.memory_space<vmem>>, vector<1x128xf32>
    %37 = vector.broadcast %36 : vector<1x128xf32> to vector<8x128xf32>
    %38 = arith.addf %35, %37 : vector<8x128xf32>
    %c0_29 = arith.constant 0 : index
    %c0_30 = arith.constant 0 : index
    %39 = vector.load %arg9[%c0_29, %c0_30] : memref<8x128xf32, #tpu.memory_space<vmem>>, vector<8x128xf32>
    tpu.vector_store %arg9[%c0_29, %c0_30], %38 {strides = array<i32>} : memref<8x128xf32, #tpu.memory_space<vmem>>, vector<8x128xf32>,
    return
  }
  func.func @transform_0(%arg0: i32) -> (i32, i32) {
    %c0_i32 = arith.constant 0 : i32
    %c0_i32_0 = arith.constant 0 : i32
    return %arg0, %c0_i32 : i32, i32
  }
  func.func @transform_1(%arg0: i32) -> (i32, i32) {
    %c0_i32 = arith.constant 0 : i32
    %c0_i32_0 = arith.constant 0 : i32
    %c0_i32_1 = arith.constant 0 : i32
    return %c0_i32, %c0_i32_0 : i32, i32
  }
  func.func @transform_2(%arg0: i32) -> (i32, i32) {
    %c0_i32 = arith.constant 0 : i32
    %c0_i32_0 = arith.constant 0 : i32
    %c0_i32_1 = arith.constant 0 : i32
    return %c0_i32, %c0_i32_0 : i32, i32
  }
  func.func @transform_3(%arg0: i32) -> (i32, i32) {
    %c0_i32 = arith.constant 0 : i32
    %c0_i32_0 = arith.constant 0 : i32
    %c0_i32_1 = arith.constant 0 : i32
    return %c0_i32, %c0_i32_0 : i32, i32
  }
  func.func @transform_4(%arg0: i32) -> (i32, i32) {
    %c0_i32 = arith.constant 0 : i32
    %c0_i32_0 = arith.constant 0 : i32
    %c0_i32_1 = arith.constant 0 : i32
    return %c0_i32, %c0_i32_0 : i32, i32
  }
  func.func @transform_5(%arg0: i32) -> (i32, i32) {
    %c0_i32 = arith.constant 0 : i32
    %c0_i32_0 = arith.constant 0 : i32
    %c0_i32_1 = arith.constant 0 : i32
    return %c0_i32, %c0_i32_0 : i32, i32
  }
  func.func @transform_6(%arg0: i32) -> (i32, i32) {
    %c0_i32 = arith.constant 0 : i32
    %c0_i32_0 = arith.constant 0 : i32
    %c0_i32_1 = arith.constant 0 : i32
    return %c0_i32, %c0_i32_0 : i32, i32
  }
  func.func @transform_7(%arg0: i32) -> (i32, i32) {
    %c0_i32 = arith.constant 0 : i32
    %c0_i32_0 = arith.constant 0 : i32
    %c0_i32_1 = arith.constant 0 : i32
    return %c0_i32, %c0_i32_0 : i32, i32
  }
  func.func @transform_8(%arg0: i32) -> (i32, i32) {
    %c0_i32 = arith.constant 0 : i32
    %c0_i32_0 = arith.constant 0 : i32
    return %arg0, %c0_i32 : i32, i32
  }
}

module attributes {stable_mosaic.version = 11 : i64} {
  func.func @_fused_mlp_kernel(%arg0: i32, %arg1: memref<8x128xf32, #tpu.memory_space<vmem>>, %arg2: memref<128x128xf32, #tpu.memory_space<vmem>>, %arg3: memref<128x128xf32, #tpu.memory_space<vmem>>, %arg4: memref<128x128xf32, #tpu.memory_space<vmem>>, %arg5: memref<128x128xf32, #tpu.memory_space<vmem>>, %arg6: memref<128x128xf32, #tpu.memory_space<vmem>>, %arg7: memref<128x128xf32, #tpu.memory_space<vmem>>, %arg8: memref<1x768xf32, #tpu.memory_space<vmem>>, %arg9: memref<8x128xf32, #tpu.memory_space<vmem>>) attributes {dimension_semantics = [#tpu.dimension_semantics<parallel>], iteration_bounds = array<i64: 2>, scalar_prefetch = 0 : i64, scratch_operands = 0 : i64, tpu.core_type = #tpu.core_type<tc>, window_params = [{transform_indices = @transform_0, window_bounds = array<i64: 8, 128>}, {pipeline_mode = #tpu.pipeline_mode<synchronous>, transform_indices = @transform_1, window_bounds = array<i64: 128, 128>}, {pipeline_mode = #tpu.pipeline_mode<synchronous>, transform_indices = @transform_2, window_bounds = array<i64: 128, 128>}, {pipeline_mode = #tpu.pipeline_mode<synchronous>, transform_indices = @transform_3, window_bounds = array<i64: 128, 128>}, {pipeline_mode = #tpu.pipeline_mode<synchronous>, transform_indices = @transform_4, window_bounds = array<i64: 128, 128>}, {pipeline_mode = #tpu.pipeline_mode<synchronous>, transform_indices = @transform_5, window_bounds = array<i64: 128, 128>}, {pipeline_mode = #tpu.pipeline_mode<synchronous>, transform_indices = @transform_6, window_bounds = array<i64: 128, 128>}, {pipeline_mode = #tpu.pipeline_mode<synchronous>, transform_indices = @transform_7, window_bounds = array<i64: 1, 768>}, {transform_indices = @transform_8, window_bounds = array<i64: 8, 128>}]} {
    %c0 = arith.constant 0 : index
    %c0_0 = arith.constant 0 : index
    %0 = vector.load %arg1[%c0, %c0_0] : memref<8x128xf32, #tpu.memory_space<vmem>>, vector<8x128xf32>
    %c0_1 = arith.constant 0 : index
    %c0_2 = arith.constant 0 : index
    %1 = vector.load %arg2[%c0_1, %c0_2] : memref<128x128xf32, #tpu.memory_space<vmem>>, vector<128x128xf32>
    %cst = arith.constant dense<0.000000e+00> : vector<8x128xf32>
    %2 = tpu.matmul %0, %1, %cst {dimension_numbers = #tpu.dot_dimension_numbers<[1], [0], [0], [1], [0, 0, 1, 1], [], []>} : vector<8x128xf32>, vector<128x128xf32>, vector<8x128xf32> -> vector<8x128xf32>
    %c0_3 = arith.constant 0 : index
    %c0_4 = arith.constant 0 : index
    %3 = vector.load %arg8[%c0_3, %c0_4] : memref<1x768xf32, #tpu.memory_space<vmem>>, vector<1x128xf32>
    %4 = vector.broadcast %3 : vector<1x128xf32> to vector<8x128xf32>
    %5 = arith.addf %2, %4 : vector<8x128xf32>
    %cst_5 = arith.constant 0.000000e+00 : f32
    %6 = vector.broadcast %cst_5 : f32 to vector<8x128xf32>
    %7 = arith.maximumf %5, %6 : vector<8x128xf32>
    %c0_6 = arith.constant 0 : index
    %c0_7 = arith.constant 0 : index
    %8 = vector.load %arg3[%c0_6, %c0_7] : memref<128x128xf32, #tpu.memory_space<vmem>>, vector<128x128xf32>
    %cst_8 = arith.constant dense<0.000000e+00> : vector<8x128xf32>
    %9 = tpu.matmul %7, %8, %cst_8 {dimension_numbers = #tpu.dot_dimension_numbers<[1], [0], [0], [1], [0, 0, 1, 1], [], []>} : vector<8x128xf32>, vector<128x128xf32>, vector<8x128xf32> -> vector<8x128xf32>
    %c0_9 = arith.constant 0 : index
    %c128 = arith.constant 128 : index
    %10 = vector.load %arg8[%c0_9, %c128] : memref<1x768xf32, #tpu.memory_space<vmem>>, vector<1x128xf32>
    %11 = vector.broadcast %10 : vector<1x128xf32> to vector<8x128xf32>
    %12 = arith.addf %9, %11 : vector<8x128xf32>
    %cst_10 = arith.constant 0.000000e+00 : f32
    %13 = vector.broadcast %cst_10 : f32 to vector<8x128xf32>
    %14 = arith.maximumf %12, %13 : vector<8x128xf32>
    %c0_11 = arith.constant 0 : index
    %c0_12 = arith.constant 0 : index
    %15 = vector.load %arg4[%c0_11, %c0_12] : memref<128x128xf32, #tpu.memory_space<vmem>>, vector<128x128xf32>
    %cst_13 = arith.constant dense<0.000000e+00> : vector<8x128xf32>
    %16 = tpu.matmul %14, %15, %cst_13 {dimension_numbers = #tpu.dot_dimension_numbers<[1], [0], [0], [1], [0, 0, 1, 1], [], []>} : vector<8x128xf32>, vector<128x128xf32>, vector<8x128xf32> -> vector<8x128xf32>
    %c0_14 = arith.constant 0 : index
    %c256 = arith.constant 256 : index
    %17 = vector.load %arg8[%c0_14, %c256] : memref<1x768xf32, #tpu.memory_space<vmem>>, vector<1x128xf32>
    %18 = vector.broadcast %17 : vector<1x128xf32> to vector<8x128xf32>
    %19 = arith.addf %16, %18 : vector<8x128xf32>
    %c0_15 = arith.constant 0 : index
    %c0_16 = arith.constant 0 : index
    %20 = vector.load %arg5[%c0_15, %c0_16] : memref<128x128xf32, #tpu.memory_space<vmem>>, vector<128x128xf32>
    %cst_17 = arith.constant dense<0.000000e+00> : vector<8x128xf32>
    %21 = tpu.matmul %19, %20, %cst_17 {dimension_numbers = #tpu.dot_dimension_numbers<[1], [0], [0], [1], [0, 0, 1, 1], [], []>} : vector<8x128xf32>, vector<128x128xf32>, vector<8x128xf32> -> vector<8x128xf32>
    %c0_18 = arith.constant 0 : index
    %c384 = arith.constant 384 : index
    %22 = vector.load %arg8[%c0_18, %c384] : memref<1x768xf32, #tpu.memory_space<vmem>>, vector<1x128xf32>
    %23 = vector.broadcast %22 : vector<1x128xf32> to vector<8x128xf32>
    %24 = arith.addf %21, %23 : vector<8x128xf32>
    %cst_19 = arith.constant 0.000000e+00 : f32
    %25 = vector.broadcast %cst_19 : f32 to vector<8x128xf32>
    %26 = arith.maximumf %24, %25 : vector<8x128xf32>
    %c0_20 = arith.constant 0 : index
    %c0_21 = arith.constant 0 : index
    %27 = vector.load %arg6[%c0_20, %c0_21] : memref<128x128xf32, #tpu.memory_space<vmem>>, vector<128x128xf32>
    %cst_22 = arith.constant dense<0.000000e+00> : vector<8x128xf32>
    %28 = tpu.matmul %26, %27, %cst_22 {dimension_numbers = #tpu.dot_dimension_numbers<[1], [0], [0], [1], [0, 0, 1, 1], [], []>} : vector<8x128xf32>, vector<128x128xf32>, vector<8x128xf32> -> vector<8x128xf32>
    %c0_23 = arith.constant 0 : index
    %c512 = arith.constant 512 : index
    %29 = vector.load %arg8[%c0_23, %c512] : memref<1x768xf32, #tpu.memory_space<vmem>>, vector<1x128xf32>
    %30 = vector.broadcast %29 : vector<1x128xf32> to vector<8x128xf32>
    %31 = arith.addf %28, %30 : vector<8x128xf32>
    %cst_24 = arith.constant 0.000000e+00 : f32
    %32 = vector.broadcast %cst_24 : f32 to vector<8x128xf32>
    %33 = arith.maximumf %31, %32 : vector<8x128xf32>
    %c0_25 = arith.constant 0 : index
    %c0_26 = arith.constant 0 : index
    %34 = vector.load %arg7[%c0_25, %c0_26] : memref<128x128xf32, #tpu.memory_space<vmem>>, vector<128x128xf32>
    %cst_27 = arith.constant dense<0.000000e+00> : vector<8x128xf32>
    %35 = tpu.matmul %33, %34, %cst_27 {dimension_numbers = #tpu.dot_dimension_numbers<[1], [0], [0], [1], [0, 0, 1, 1], [], []>} : vector<8x128xf32>, vector<128x128xf32>, vector<8x128xf32> -> vector<8x128xf32>
    %c0_28 = arith.constant 0 : index
    %c640 = arith.constant 640 : index
    %36 = vector.load %arg8[%c0_28, %c640] : memref<1x768xf32, #tpu.memory_space<vmem>>, vector<1x128xf32>
    %37 = vector.broadcast %36 : vector<1x128xf32> to vector<8x128xf32>
    %38 = arith.addf %35, %37 : vector<8x128xf32>
    %c0_29 = arith.constant 0 : index
    %c0_30 = arith.constant 0 : index
    %39 = vector.load %arg9[%c0_29, %c0_30] : memref<8x128xf32, #tpu.memory_space<vmem>>, vector<8x128xf32>
    tpu.vector_store %arg9[%c0_29, %c0_30], %38 {strides = array<i32>} : memref<8x128xf32, #tpu.memory_space<vmem>>, vector<8x128xf32>,
    return
  }
  func.func @transform_0(%arg0: i32) -> (i32, i32) {
    %c0_i32 = arith.constant 0 : i32
    %c0_i32_0 = arith.constant 0 : i32
    return %arg0, %c0_i32 : i32, i32
  }
  func.func @transform_1(%arg0: i32) -> (i32, i32) {
    %c0_i32 = arith.constant 0 : i32
    %c0_i32_0 = arith.constant 0 : i32
    %c0_i32_1 = arith.constant 0 : i32
    return %c0_i32, %c0_i32_0 : i32, i32
  }
  func.func @transform_2(%arg0: i32) -> (i32, i32) {
    %c0_i32 = arith.constant 0 : i32
    %c0_i32_0 = arith.constant 0 : i32
    %c0_i32_1 = arith.constant 0 : i32
    return %c0_i32, %c0_i32_0 : i32, i32
  }
  func.func @transform_3(%arg0: i32) -> (i32, i32) {
    %c0_i32 = arith.constant 0 : i32
    %c0_i32_0 = arith.constant 0 : i32
    %c0_i32_1 = arith.constant 0 : i32
    return %c0_i32, %c0_i32_0 : i32, i32
  }
  func.func @transform_4(%arg0: i32) -> (i32, i32) {
    %c0_i32 = arith.constant 0 : i32
    %c0_i32_0 = arith.constant 0 : i32
    %c0_i32_1 = arith.constant 0 : i32
    return %c0_i32, %c0_i32_0 : i32, i32
  }
  func.func @transform_5(%arg0: i32) -> (i32, i32) {
    %c0_i32 = arith.constant 0 : i32
    %c0_i32_0 = arith.constant 0 : i32
    %c0_i32_1 = arith.constant 0 : i32
    return %c0_i32, %c0_i32_0 : i32, i32
  }
  func.func @transform_6(%arg0: i32) -> (i32, i32) {
    %c0_i32 = arith.constant 0 : i32
    %c0_i32_0 = arith.constant 0 : i32
    %c0_i32_1 = arith.constant 0 : i32
    return %c0_i32, %c0_i32_0 : i32, i32
  }
  func.func @transform_7(%arg0: i32) -> (i32, i32) {
    %c0_i32 = arith.constant 0 : i32
    %c0_i32_0 = arith.constant 0 : i32
    %c0_i32_1 = arith.constant 0 : i32
    return %c0_i32, %c0_i32_0 : i32, i32
  }
  func.func @transform_8(%arg0: i32) -> (i32, i32) {
    %c0_i32 = arith.constant 0 : i32
    %c0_i32_0 = arith.constant 0 : i32
    return %arg0, %c0_i32 : i32, i32
  }
}

</mosaic_0001>

<bundles_post_ra>
// kernel: tpu_custom_call.1
= control target key start
LH: loop header
LB: loop body
LE: loop exit
PB: predicated region body
PF: predicated region fallthrough
CT: control target
= control target key end

     0   :  { %s2470_s0 = inlined_call_operand.hbm [shape: f32[16,128], index: 0, kind: input, shape index: {}]   ;;  %s2471_s1 = inlined_call_operand.hbm [shape: f32[128,128], index: 1, kind: input, shape index: {}]   ;;  %s2472_s2 = inlined_call_operand.hbm [shape: f32[128,128], index: 2, kind: input, shape index: {}]   ;;  %s2473_s3 = inlined_call_operand.hbm [shape: f32[128,128], index: 3, kind: input, shape index: {}]   ;;  %s2474_s4 = inlined_call_operand.hbm [shape: f32[128,128], index: 4, kind: input, shape index: {}]   ;;  %s2475_s5 = inlined_call_operand.hbm [shape: f32[128,128], index: 5, kind: input, shape index: {}]   ;;  %s2476_s6 = inlined_call_operand.hbm [shape: f32[128,128], index: 6, kind: input, shape index: {}]   ;;  %s2477_s7 = inlined_call_operand.vmem [shape: f32[1,768], index: 7, kind: input, shape index: {}]   ;;  %s2478_s8 = inlined_call_operand.hbm [shape: f32[16,128], index: 8, kind: output, shape index: {}]  }
   0x1   :  { %2482 = sst [smem:[#allocation20_spill]] %s2471_s1 }
   0x2   :  { %13 = vsyncpa [#allocation3], 0 }
   0x3   :  { %15 = vsyncpa [#allocation3 + $0x1], 0 }
   0x4   :  { %16 = vsyncpa [#allocation6], 0 }
   0x5   :  { %17 = vsyncpa [#allocation9], 0 }
   0x6   :  { %18 = vsyncpa [#allocation12], 0 }
   0x7   :  { %19 = vsyncpa [#allocation4], 0 }
   0x8   :  { %21 = vsyncpa [#allocation4 + $0x1], 0  ;;  %s2047_s27 = smov 0   ;;  %s2049_s28 = smov 0  }
   0x9   :  { %s2051_s29 = smov 0   ;;  %s2053_s30 = smov 0  }
   0xa LB: > { %s1989_s9 = smov [#allocation5]   ;;  %s2068_s11 = sadd.s32 4294967295, %s1987_s30   ;;  %s1987_s30 = sphi %s2053_s30, %s2506_s30   ;;  %s1983_s29 = sphi %s2051_s29, %s2505_s29   ;;  %s1979_s28 = sphi %s2049_s28, %s2504_s28   ;;  %s1975_s27 = sphi %s2047_s27, %s2503_s27  }
   0xb   : > { %s243_s10 = sshll.u32 %s1989_s9, 4  ;;  %p1114_p0 = scmp.ge.s32.totalorder %s1987_s30, 1  ;;  %s2073_s10 = int_to_ptr.vmem [resolvable:$true] %s243_s10 }
   0xc   : > { %p2479_p1 = scmp.eq.s32.totalorder %s2068_s11, 0  ;;  %p231_p2 = scmp.lt.s32.totalorder %s1987_s30, 3 }
   0xd   : > { %s1990_s13 = smov [#allocation8]   ;;  %s1991_s16 = smov [#allocation11]  }
   0xe   : > { %p2075_p3 = pnand %p1114_p0, %p231_p2  ;;  %s269_s14 = sshll.u32 %s1990_s13, 4  ;;  %s2088_s14 = int_to_ptr.vmem [resolvable:$true] %s269_s14 }
   0xf   : > { %s295_s17 = sshll.u32 %s1991_s16, 4  ;;  %s2485_s1 = sld [smem:[#allocation20_spill]]  ;;  %s2090_s17 = int_to_ptr.vmem [resolvable:$true] %s295_s17 }
  0x10   : > { %s2483_s12 = scalar_select %p2075_p3, 1, 0 }
  0x11   : > { %p1627_p5 = pneg %p2075_p3 }
  0x13   : > { %p2084_p6 = pnand %p1627_p5, %p2479_p1 }
  0x15   : > { %s1711_s20 = scalar_lea.hbm %s2485_s1, 2048  ;;  %p2100_p8 = pneg %p2084_p6 }
  0x16   : > { %p1712_p7 = scmp.ne.s32.totalorder %s2485_s1, %s1711_s20  ;;  %p1718_p11 = scmp.lt.u32.totalorder %s1711_s20, %s2485_s1 }
  0x18   : > { %p1714_p9 = pnand %p2100_p8, %p1712_p7 }
  0x1a   : > { %p1715_p10 = pneg %p1714_p9 }
  0x1c   : > { %p1720_p12 = pnand %p1718_p11, %p1715_p10 }
  0x1e   : > { %1723 = shalt.err (!%p1720_p12)
}
  0x1f   : > { %s1724_s26 = scalar_lea.vmem %s2073_s10, 2048  ;;  %p1732_p5 = scmp.lt.s32.totalorder %s2073_s10, %s2073_s10 }
  0x20   : > { %p1725_p13 = scmp.ne.s32.totalorder %s2073_s10, %s1724_s26  ;;  %p1733_p4 = scmp.lt.s32.totalorder %s1724_s26, %s1724_s26 }
  0x22   : > { %p1727_p0 = pnand %p1725_p13, %p2100_p8  ;;  %p1734_p7 = por %p1733_p4, %p1732_p5 }
  0x24   : > { %p1728_p2 = pneg %p1727_p0 }
  0x26   : > { %p1735_p9 = pnand %p1734_p7, %p1728_p2 }
  0x28   : > { %1738 = shalt.err (!%p1735_p9)
}
  0x29   : > { %s1992_s9 = smov 128   ;;  %s1993_s13 = smov 8  }
  0x2a   : > { %1630 = dma.hbm_to_vmem [thread:$0]  (!%p2084_p6), %s2485_s1, 2048, %s2073_s10, [#allocation6], %s1992_s9, %s1992_s9, %s1993_s13  }
  0x2b   : > { %s1739_s21 = scalar_lea.hbm %s2473_s3, 2048 }
  0x2c   : > { %p1740_p4 = scmp.ne.s32.totalorder %s2473_s3, %s1739_s21  ;;  %p1746_p12 = scmp.lt.u32.totalorder %s1739_s21, %s2473_s3 }
  0x2e   : > { %p1742_p10 = pnand %p1740_p4, %p2100_p8 }
  0x30   : > { %p1743_p11 = pneg %p1742_p10 }
  0x32   : > { %p1748_p13 = pnand %p1746_p12, %p1743_p11 }
  0x34   : > { %1751 = shalt.err (!%p1748_p13)
}
  0x35   : > { %s1752_s10 = scalar_lea.vmem %s2088_s14, 2048  ;;  %p1760_p7 = scmp.lt.s32.totalorder %s2088_s14, %s2088_s14 }
  0x36   : > { %p1753_p0 = scmp.ne.s32.totalorder %s2088_s14, %s1752_s10  ;;  %p1761_p9 = scmp.lt.s32.totalorder %s1752_s10, %s1752_s10 }
  0x38   : > { %p1755_p2 = pnand %p1753_p0, %p2100_p8  ;;  %p1762_p4 = por %p1761_p9, %p1760_p7 }
  0x3a   : > { %p1756_p5 = pneg %p1755_p2 }
  0x3c   : > { %p1763_p10 = pnand %p1762_p4, %p1756_p5 }
  0x3e   : > { %1766 = shalt.err (!%p1763_p10)
}
  0x3f   : > { %1636 = dma.hbm_to_vmem [thread:$0]  (!%p2084_p6), %s2473_s3, 2048, %s2088_s14, [#allocation9], %s1992_s9, %s1992_s9, %s1993_s13  }
  0x40   : > { %s1767_s21 = scalar_lea.hbm %s2475_s5, 2048 }
  0x41   : > { %p1768_p11 = scmp.ne.s32.totalorder %s2475_s5, %s1767_s21  ;;  %p1774_p0 = scmp.lt.u32.totalorder %s1767_s21, %s2475_s5 }
  0x43   : > { %p1770_p12 = pnand %p1768_p11, %p2100_p8 }
  0x45   : > { %p1771_p13 = pneg %p1770_p12 }
  0x47   : > { %p1776_p2 = pnand %p1774_p0, %p1771_p13 }
  0x49   : > { %1779 = shalt.err (!%p1776_p2)
}
  0x4a   : > { %s1780_s14 = scalar_lea.vmem %s2090_s17, 2048  ;;  %p1788_p4 = scmp.lt.s32.totalorder %s2090_s17, %s2090_s17 }
  0x4b   : > { %p1781_p5 = scmp.ne.s32.totalorder %s2090_s17, %s1780_s14  ;;  %p1789_p10 = scmp.lt.s32.totalorder %s1780_s14, %s1780_s14 }
  0x4d   : > { %p1783_p7 = pnand %p1781_p5, %p2100_p8  ;;  %p1790_p11 = por %p1789_p10, %p1788_p4 }
  0x4f   : > { %p1784_p9 = pneg %p1783_p7 }
  0x51   : > { %p1791_p12 = pnand %p1790_p11, %p1784_p9 }
  0x53   : > { %1794 = shalt.err (!%p1791_p12)
}
  0x54   : > { %1642 = dma.hbm_to_vmem [thread:$0]  (!%p2084_p6), %s2475_s5, 2048, %s2090_s17, [#allocation12], %s1992_s9, %s1992_s9, %s1993_s13  }
  0x55   : > { %s1994_s18 = smov [#allocation7]   ;;  %s1995_s20 = smov [#allocation10]  }
  0x56   : > { %s256_s19 = sshll.u32 %s1994_s18, 4  ;;  %s282_s21 = sshll.u32 %s1995_s20, 4  ;;  %s257_s19 = int_to_ptr.vmem [resolvable:$true] %s256_s19  ;;  %s283_s21 = int_to_ptr.vmem [resolvable:$true] %s282_s21 }
  0x57   : > { %s1795_s25 = scalar_lea.hbm %s2472_s2, 2048 }
  0x58   : > { %p1796_p13 = scmp.ne.s32.totalorder %s2472_s2, %s1795_s25  ;;  %p1802_p5 = scmp.lt.u32.totalorder %s1795_s25, %s2472_s2 }
  0x5a   : > { %p1798_p0 = pnand %p1796_p13, %p2100_p8 }
  0x5c   : > { %p1799_p2 = pneg %p1798_p0 }
  0x5e   : > { %p1804_p7 = pnand %p1802_p5, %p1799_p2 }
  0x60   : > { %1807 = shalt.err (!%p1804_p7)
}
  0x61   : > { %s1808_s17 = scalar_lea.vmem %s257_s19, 2048  ;;  %p1816_p11 = scmp.lt.s32.totalorder %s257_s19, %s257_s19 }
  0x62   : > { %p1809_p9 = scmp.ne.s32.totalorder %s257_s19, %s1808_s17  ;;  %p1817_p12 = scmp.lt.s32.totalorder %s1808_s17, %s1808_s17 }
  0x64   : > { %p1811_p4 = pnand %p1809_p9, %p2100_p8  ;;  %p1818_p1 = por %p1817_p12, %p1816_p11 }
  0x66   : > { %p1812_p10 = pneg %p1811_p4 }
  0x68   : > { %p1819_p3 = pnand %p1818_p1, %p1812_p10 }
  0x6a   : > { %1822 = shalt.err (!%p1819_p3)
}
  0x6b   : > { %1633 = dma.hbm_to_vmem [thread:$0]  (!%p2084_p6), %s2472_s2, 2048, %s257_s19, [#allocation6], %s1992_s9, %s1992_s9, %s1993_s13  }
  0x6c   : > { %s1823_s22 = scalar_lea.hbm %s2474_s4, 2048 }
  0x6d   : > { %p1824_p1 = scmp.ne.s32.totalorder %s2474_s4, %s1823_s22  ;;  %p1830_p0 = scmp.lt.u32.totalorder %s1823_s22, %s2474_s4 }
  0x6f   : > { %p1826_p3 = pnand %p1824_p1, %p2100_p8 }
  0x71   : > { %p1827_p13 = pneg %p1826_p3 }
  0x73   : > { %p1832_p2 = pnand %p1830_p0, %p1827_p13 }
  0x75   : > { %1835 = shalt.err (!%p1832_p2)
}
  0x76   : > { %s1836_s10 = scalar_lea.vmem %s283_s21, 2048  ;;  %p1844_p4 = scmp.lt.s32.totalorder %s283_s21, %s283_s21 }
  0x77   : > { %p1837_p5 = scmp.ne.s32.totalorder %s283_s21, %s1836_s10  ;;  %p1845_p10 = scmp.lt.s32.totalorder %s1836_s10, %s1836_s10 }
  0x79   : > { %p1839_p7 = pnand %p1837_p5, %p2100_p8  ;;  %p1846_p11 = por %p1845_p10, %p1844_p4 }
  0x7b   : > { %p1840_p9 = pneg %p1839_p7 }
  0x7d   : > { %p1847_p12 = pnand %p1846_p11, %p1840_p9 }
  0x7f   : > { %1850 = shalt.err (!%p1847_p12)
}
  0x80   : > { %1639 = dma.hbm_to_vmem [thread:$0]  (!%p2084_p6), %s2474_s4, 2048, %s283_s21, [#allocation9], %s1992_s9, %s1992_s9, %s1993_s13  }
  0x81   : > { %s1996_s1 = smov [#allocation13]   ;;  %s1851_s22 = scalar_lea.hbm %s2476_s6, 2048 }
  0x82   : > { %s308_s16 = sshll.u32 %s1996_s1, 4  ;;  %p1852_p1 = scmp.ne.s32.totalorder %s2476_s6, %s1851_s22  ;;  %s309_s16 = int_to_ptr.vmem [resolvable:$true] %s308_s16 }
  0x83   : > { %p1858_p0 = scmp.lt.u32.totalorder %s1851_s22, %s2476_s6 }
  0x84   : > { %p1854_p3 = pnand %p1852_p1, %p2100_p8 }
  0x86   : > { %p1855_p13 = pneg %p1854_p3 }
  0x88   : > { %p1860_p2 = pnand %p1858_p0, %p1855_p13 }
  0x8a   : > { %1863 = shalt.err (!%p1860_p2)
}
  0x8b   : > { %s1864_s21 = scalar_lea.vmem %s309_s16, 2048  ;;  %p1872_p4 = scmp.lt.s32.totalorder %s309_s16, %s309_s16 }
  0x8c   : > { %p1865_p5 = scmp.ne.s32.totalorder %s309_s16, %s1864_s21  ;;  %p1873_p10 = scmp.lt.s32.totalorder %s1864_s21, %s1864_s21 }
  0x8e   : > { %p1867_p7 = pnand %p1865_p5, %p2100_p8  ;;  %p1874_p11 = por %p1873_p10, %p1872_p4 }
  0x90   : > { %p1868_p9 = pneg %p1867_p7 }
  0x92   : > { %p1875_p12 = pnand %p1874_p11, %p1868_p9 }
  0x94   : > { %1878 = shalt.err (!%p1875_p12)
}
  0x95   : > { %1645 = dma.hbm_to_vmem [thread:$0]  (!%p2084_p6), %s2476_s6, 2048, %s309_s16, [#allocation12], %s1992_s9, %s1992_s9, %s1993_s13  }
  0x96   : > { %s1113_s15 = sadd.s32 4294967294, %s1987_s30   ;;  %s2241_s23 = sadd.s32 1, %s1987_s30  }
  0x97   : > { %s31_s17 = ssub.s32 %s1987_s30, %s2241_s23  ;;  %s34_s1 = sadd.s32 1, %s1983_s29 }
  0x98   : > { %p32_p8 = scmp.eq.s32.totalorder %s31_s17, 0  ;;  %p41_p1 = scmp.ne.s32.totalorder %s1983_s29, %s1979_s28 }
  0x99   : > { %p42_p3 = scmp.eq.s32.totalorder %s1987_s30, 0  ;;  %p47_p13 = scmp.ne.s32.totalorder %s1979_s28, %s1975_s27 }
  0x9a   : > { %s2252_s18 = scalar_select %p32_p8, %s1983_s29, %s34_s1  }
  0x9b   : > { %p2254_p0 = por %p42_p3, %p41_p1  ;;  %p2488_p2 = scmp.eq.s32.totalorder %s2068_s11, 0 }
  0x9c   : > { %p218_p5 = scmp.eq.s32.totalorder %s2068_s11, 1  ;;  %p224_p7 = scmp.eq.s32.totalorder %s1113_s15, 1 }
  0x9d   : > { %p2260_p6 = por %p2488_p2, %p47_p13  ;;  %p1660_p9 = scmp.lt.s32.totalorder %s1987_s30, 2 }
  0x9e   : > { %s325_s13 = sand.u32 1, %s1983_s29   ;;  %p2267_p4 = por %p218_p5, %p41_p1 }
  0x9f   : > { %p2271_p10 = por %p224_p7, %p47_p13  ;;  %s1122_s24 = sshll.u32 %s325_s13, 3 }
  0xa0   : > { %s2490_s16 = scalar_select %p2267_p4, 1, 0 }
  0xa1   : > { %s2491_s22 = scalar_select %p2271_p10, 1, 0 }
  0xa2   : > { %s1123_s25 = sshll.u32 %s1987_s30, 7  ;;  %s329_s10 = scalar_lea.vmem [#allocation2], %s1122_s24 }
  0xa3   : > { %s2279_s21 = scalar_lea.hbm %s2470_s0, %s1123_s25  ;;  %s336_s19 = sshll.u32 %s329_s10, 4  ;;  %s2281_s19 = int_to_ptr.vmem [resolvable:$true] %s336_s19 }
  0xa4   : > { %p2285_p11 = pnand %p1660_p9, %p2254_p0  ;;  %s326_s17 = scalar_lea.sflag [#allocation3], %s325_s13 }
  0xa5   : > { %s1879_s1 = scalar_lea.hbm %s2279_s21, 128  ;;  %s1884_s26 = scalar_lea.hbm %s2470_s0, 256 }
  0xa6   : > { %p1880_p12 = scmp.ne.s32.totalorder %s2279_s21, %s1879_s1  ;;  %p1881_p8 = pneg %p2285_p11 }
  0xa7   : > { %p1885_p13 = scmp.lt.u32.totalorder %s2279_s21, %s2470_s0  ;;  %p1886_p0 = scmp.lt.u32.totalorder %s1884_s26, %s1879_s1 }
  0xa8   : > { %p1882_p1 = pnand %p1881_p8, %p1880_p12  ;;  %p1888_p5 = scmp.lt.u32.totalorder %s1879_s1, %s2279_s21 }
  0xa9   : > { %p1887_p2 = por %p1886_p0, %p1885_p13 }
  0xaa   : > { %p1883_p3 = pneg %p1882_p1 }
  0xab   : > { %p1889_p7 = por %p1888_p5, %p1887_p2 }
  0xad   : > { %p1890_p9 = pnand %p1889_p7, %p1883_p3 }
  0xaf   : > { %1893 = shalt.err (!%p1890_p9)
}
  0xb0   : > { %s1894_s13 = scalar_lea.vmem %s2281_s19, 128  ;;  %s1997_s10 = smov [#allocation2]  }
  0xb1   : > { %p1895_p12 = scmp.ne.s32.totalorder %s2281_s19, %s1894_s13  ;;  %s1899_s24 = sshll.u32 %s1997_s10, 4  ;;  %s1900_s24 = int_to_ptr.vmem [resolvable:$false] %s1899_s24 }
  0xb2   : > { %s1901_s25 = scalar_lea.vmem %s1900_s24, 256  ;;  %p1902_p4 = scmp.lt.s32.totalorder %s2281_s19, %s1900_s24 }
  0xb3   : > { %p1897_p1 = pnand %p1895_p12, %p1881_p8  ;;  %p1903_p13 = scmp.lt.s32.totalorder %s1901_s25, %s1894_s13 }
  0xb5   : > { %p1898_p10 = pneg %p1897_p1  ;;  %p1904_p0 = por %p1903_p13, %p1902_p4 }
  0xb7   : > { %p1905_p2 = pnand %p1904_p0, %p1898_p10 }
  0xb9   : > { %1908 = shalt.err (!%p1905_p2)
}
  0xba   : > { %1649 = dma.hbm_to_vmem [thread:$0]  (!%p2285_p11), %s2279_s21, 128, %s2281_s19, %s326_s17  }
  0xbb   : > { %p2493_p3 = scmp.ne.s32.totalorder %s2483_s12, 0 }
  0xbc   : > { %s2317_s1 = sand.u32 (!%p2493_p3), 1, %s1979_s28  }
  0xbd   : > { %345 = sbr.rel (%p2493_p3) target bundleno = 1546 (0x60a), region = 52  ;;  %s1125_s26 = sshll.u32 (!%p2493_p3), %s2317_s1, 3 }
  0xbe   : > { %s348_s20 = scalar_lea.sflag (!%p2493_p3), [#allocation3], %s2317_s1  ;;  %s2323_s14 = scalar_lea.vmem (!%p2493_p3), [#allocation2], %s1125_s26 }
  0xc4   : > { %1954 = dma.done.wait (%p2260_p6), %s348_s20, 128  }
  0xc5   : > { %1956 = vsyncadd (%p2260_p6), %s348_s20, 4294967168  ;;  %p2494_p4 = scmp.eq.s32.totalorder %s2068_s11, 0 }
  0xc7   : > { %1958 = dma.done.wait (%p2494_p4), [#allocation6], 4096   ;;  %p2495_p10 = pmov %p2494_p4 }
  0xc8   : > { %p2496_p11 = pmov %p2494_p4 }
  0xc9   : > { %1960 = vsyncadd (%p2495_p10), [#allocation6], 4294963200 }
  0xca   : > { %1962 = dma.done.wait (%p2496_p11), [#allocation9], 4096   ;;  %p2497_p8 = pmov %p2494_p4 }
  0xcb   : > { %p2498_p5 = pmov %p2494_p4 }
  0xcc   : > { %1964 = vsyncadd (%p2497_p8), [#allocation9], 4294963200 }
  0xcd   : > { %1966 = dma.done.wait (%p2498_p5), [#allocation12], 4096   ;;  %p2499_p7 = pmov %p2494_p4 }
  0xce   : > { %v1998_v0 = vmov 0.0|0.0   ;;  %vm1999_vm0 = vmmov 0   ;;  %v2000_v1 = vmov 0.0   ;;  %v409_v2 = vld [vmem:[#allocation5] sm:$0xff]  ;;  %v410_v3 = vld [vmem:[#allocation5 + $0x8] sm:$0xff]  ;;  %v411_v4 = vld [vmem:[#allocation5 + $0x10] sm:$0xff] }
  0xcf   : > { %1968 = vsyncadd (%p2499_p7), [#allocation12], 4294963200  ;;  %1455 = vmatprep.subr.bf16.mxu0 %v1998_v0  ;;  %1277 = vmatprep.mubr.msk.f32.mxu0 %vm1999_vm0, %v2000_v1  ;;  %v1456_v5 = vpack.c.bf16 %v410_v3, %v409_v2  ;;  %v412_v6 = vld [vmem:[#allocation5 + $0x18] sm:$0xff]  ;;  %v413_v8 = vld [vmem:[#allocation5 + $0x20] sm:$0xff]  ;;  %s1140_s12 = sshll.u32 %s2068_s11, 7  ;;  %s407_s9 = scalar_lea.vmem [#allocation14], %s1125_s26 }
  0xd0   : > { %1479 = vmatprep.subr.bf16.mxu1 %v1998_v0  ;;  %1312 = vmatprep.mubr.msk.f32.mxu1 %vm1999_vm0, %v2000_v1  ;;  %v1459_v7 = vpack.c.bf16 %v412_v6, %v411_v4  ;;  %v414_v9 = vld [vmem:[#allocation5 + $0x28] sm:$0xff]  ;;  %v503_v10 = vld [vmem:[#allocation7] sm:$0xff]  ;;  %v505_v12 = vld [vmem:[#allocation7 + $0x10] sm:$0xff]  ;;  %s986_s21 = sshll.u32 %s407_s9, 4  ;;  %s2426_s17 = scalar_lea.hbm %s2478_s8, %s1140_s12  ;;  %s2428_s21 = int_to_ptr.vmem [resolvable:$true] %s986_s21 }
  0xd1   : > { %1457 = vmatpush3.bf16.msra.mxu0 %v1456_v5  ;;  %v504_v11 = vld [vmem:[#allocation7 + $0x8] sm:$0xff]  ;;  %v506_v13 = vld [vmem:[#allocation7 + $0x18] sm:$0xff]  ;;  %v1462_v14 = vpack.c.bf16 %v414_v9, %v413_v8  ;;  %v415_v16 = vld [vmem:[#allocation5 + $0x30] sm:$0xff]  ;;  %s973_s13 = scalar_lea.sflag [#allocation4], %s2317_s1  ;;  %s1909_s10 = scalar_lea.vmem %s2428_s21, 128 }
  0xd2   : > { %1458 = vmatprep.subr.bf16.mxu0 %v1998_v0  ;;  %v1480_v15 = vpack.c.bf16 %v504_v11, %v503_v10  ;;  %v416_v17 = vld [vmem:[#allocation5 + $0x38] sm:$0xff]  ;;  %v1483_v18 = vpack.c.bf16 %v506_v13, %v505_v12  ;;  %v507_v19 = vld [vmem:[#allocation7 + $0x20] sm:$0xff]  ;;  %v508_v20 = vld [vmem:[#allocation7 + $0x28] sm:$0xff]  ;;  %p1910_p6 = scmp.ne.s32.totalorder %s2428_s21, %s1909_s10  ;;  %p2500_p9 = scmp.ne.s32.totalorder %s2490_s16, 0 }
  0xd3   : > { %v1465_v21 = vpack.c.bf16 %v416_v17, %v415_v16  ;;  %v417_v22 = vld [vmem:[#allocation5 + $0x40] sm:$0xff]  ;;  %v418_v23 = vld [vmem:[#allocation5 + $0x48] sm:$0xff]  ;;  %v1486_v24 = vpack.c.bf16 %v508_v20, %v507_v19  ;;  %v509_v25 = vld [vmem:[#allocation7 + $0x30] sm:$0xff]  ;;  %s2001_s11 = smov [#allocation14]  }
  0xd4   : > { %1481 = vmatpush3.bf16.msra.mxu1 %v1480_v15  ;;  %v510_v26 = vld [vmem:[#allocation7 + $0x38] sm:$0xff]  ;;  %v1468_v27 = vpack.c.bf16 %v418_v23, %v417_v22  ;;  %v419_v28 = vld [vmem:[#allocation5 + $0x50] sm:$0xff]  ;;  %v511_v31 = vld [vmem:[#allocation7 + $0x40] sm:$0xff]  ;;  %p1911_p12 = pnand %p1910_p6, %p2500_p9  ;;  %s1913_s26 = sshll.u32 %s2001_s11, 4  ;;  %s1914_s26 = int_to_ptr.vmem [resolvable:$false] %s1913_s26 }
  0xd5   : > { %1460 = vmatpush3.bf16.msra.mxu0 %v1459_v7  ;;  %1482 = vmatprep.subr.bf16.mxu1 %v1998_v0  ;;  %v420_v29 = vld [vmem:[#allocation5 + $0x58] sm:$0xff]  ;;  %v1489_v30 = vpack.c.bf16 %v510_v26, %v509_v25  ;;  %v512_v32 = vld [vmem:[#allocation7 + $0x48] sm:$0xff]  ;;  %v421_v34 = vld [vmem:[#allocation5 + $0x60] sm:$0xff]  ;;  %s1915_s24 = scalar_lea.vmem %s1914_s26, 256  ;;  %p1916_p13 = scmp.lt.s32.totalorder %s2428_s21, %s1914_s26 }
  0xd6   : > { %1461 = vmatprep.subr.bf16.mxu0 %v1998_v0  ;;  %v1471_v33 = vpack.c.bf16 %v420_v29, %v419_v28  ;;  %v422_v35 = vld [vmem:[#allocation5 + $0x68] sm:$0xff]  ;;  %v1492_v36 = vpack.c.bf16 %v512_v32, %v511_v31  ;;  %v513_v37 = vld [vmem:[#allocation7 + $0x50] sm:$0xff]  ;;  %v514_v38 = vld [vmem:[#allocation7 + $0x58] sm:$0xff]  ;;  %p1912_p1 = pneg %p1911_p12  ;;  %p1917_p0 = scmp.lt.s32.totalorder %s1915_s24, %s1909_s10 }
  0xd7   : > { %v1474_v39 = vpack.c.bf16 %v422_v35, %v421_v34  ;;  %v423_v40 = vld [vmem:[#allocation5 + $0x70] sm:$0xff]  ;;  %v424_v41 = vld [vmem:[#allocation5 + $0x78] sm:$0xff]  ;;  %v1495_v42 = vpack.c.bf16 %v514_v38, %v513_v37  ;;  %v515_v43 = vld [vmem:[#allocation7 + $0x60] sm:$0xff] }
  0xd8   : > { %1484 = vmatpush3.bf16.msra.mxu1 %v1483_v18  ;;  %v516_v44 = vld [vmem:[#allocation7 + $0x68] sm:$0xff]  ;;  %v1477_v45 = vpack.c.bf16 %v424_v41, %v423_v40  ;;  %v408_v47 = vld [vmem:[%s2323_s14] sm:$0xff]  ;;  %v597_v51 = vld [vmem:[#allocation8] sm:$0xff]  ;;  %p1918_p2 = por %p1917_p0, %p1916_p13 }
  0xd9   : > { %1463 = vmatpush3.bf16.msra.mxu0 %v1462_v14  ;;  %1485 = vmatprep.subr.bf16.mxu1 %v1998_v0  ;;  %v1498_v46 = vpack.c.bf16 %v516_v44, %v515_v43  ;;  %v517_v48 = vld [vmem:[#allocation7 + $0x70] sm:$0xff]  ;;  %v518_v49 = vld [vmem:[#allocation7 + $0x78] sm:$0xff]  ;;  %v598_v52 = vld [vmem:[#allocation8 + $0x8] sm:$0xff] }
  0xda   : > { %1464 = vmatprep.subr.bf16.mxu0 %v1998_v0  ;;  %v1501_v50 = vpack.c.bf16 %v518_v49, %v517_v48  ;;  %v599_v53 = vld [vmem:[#allocation8 + $0x10] sm:$0xff]  ;;  %v1504_v54 = vpack.c.bf16 %v598_v52, %v597_v51  ;;  %v600_v55 = vld [vmem:[#allocation8 + $0x18] sm:$0xff]  ;;  %v601_v57 = vld [vmem:[#allocation8 + $0x20] sm:$0xff]  ;;  %p1919_p3 = pnand %p1918_p2, %p1912_p1 }
  0xdb   : > { %v1507_v56 = vpack.c.bf16 %v600_v55, %v599_v53  ;;  %v602_v58 = vld [vmem:[#allocation8 + $0x28] sm:$0xff]  ;;  %v603_v60 = vld [vmem:[#allocation8 + $0x30] sm:$0xff]  ;;  %v604_v61 = vld [vmem:[#allocation8 + $0x38] sm:$0xff] }
  0xdc   : > { %1487 = vmatpush3.bf16.msra.mxu1 %v1486_v24  ;;  %v1510_v59 = vpack.c.bf16 %v602_v58, %v601_v57  ;;  %v1513_v62 = vpack.c.bf16 %v604_v61, %v603_v60  ;;  %v605_v63 = vld [vmem:[#allocation8 + $0x40] sm:$0xff]  ;;  %v606_v2 = vld [vmem:[#allocation8 + $0x48] sm:$0xff]  ;;  %v607_v4 = vld [vmem:[#allocation8 + $0x50] sm:$0xff] }
  0xdd   : > { %1466 = vmatpush3.bf16.msra.mxu0 %v1465_v21  ;;  %1488 = vmatprep.subr.bf16.mxu1 %v1998_v0  ;;  %v1516_v3 = vpack.c.bf16 %v606_v2, %v605_v63  ;;  %v608_v5 = vld [vmem:[#allocation8 + $0x58] sm:$0xff]  ;;  %v609_v7 = vld [vmem:[#allocation8 + $0x60] sm:$0xff]  ;;  %v610_v8 = vld [vmem:[#allocation8 + $0x68] sm:$0xff] }
  0xde   : > { %1467 = vmatprep.subr.bf16.mxu0 %v1998_v0  ;;  %v1519_v6 = vpack.c.bf16 %v608_v5, %v607_v4  ;;  %v1522_v9 = vpack.c.bf16 %v610_v8, %v609_v7  ;;  %v1133_v10 = vld [vmem:[%s2477_s7] ss:$0 sm:$0xff]  ;;  %v612_v16 = vld [vmem:[#allocation8 + $0x78] sm:$0xff]  ;;  %v690_v18 = vld [vmem:[#allocation10] sm:$0xff] }
  0xdf   : > { %v611_v15 = vld [vmem:[#allocation8 + $0x70] sm:$0xff]  ;;  %v691_v19 = vld [vmem:[#allocation10 + $0x8] sm:$0xff]  ;;  %v693_v22 = vld [vmem:[#allocation10 + $0x18] sm:$0xff] }
  0xe0   : > { %1490 = vmatpush3.bf16.msra.mxu1 %v1489_v30  ;;  %v1525_v17 = vpack.c.bf16 %v612_v16, %v611_v15  ;;  %v692_v20 = vld [vmem:[#allocation10 + $0x10] sm:$0xff]  ;;  %v1528_v21 = vpack.c.bf16 %v691_v19, %v690_v18  ;;  %v694_v24 = vld [vmem:[#allocation10 + $0x20] sm:$0xff]  ;;  %v695_v25 = vld [vmem:[#allocation10 + $0x28] sm:$0xff] }
  0xe1   : > { %1469 = vmatpush3.bf16.msra.mxu0 %v1468_v27  ;;  %1491 = vmatprep.subr.bf16.mxu1 %v1998_v0  ;;  %v1531_v23 = vpack.c.bf16 %v693_v22, %v692_v20  ;;  %v1534_v26 = vpack.c.bf16 %v695_v25, %v694_v24  ;;  %v696_v27 = vld [vmem:[#allocation10 + $0x30] sm:$0xff]  ;;  %v697_v28 = vld [vmem:[#allocation10 + $0x38] sm:$0xff]  ;;  %v698_v30 = vld [vmem:[#allocation10 + $0x40] sm:$0xff] }
  0xe2   : > { %1470 = vmatprep.subr.bf16.mxu0 %v1998_v0  ;;  %v1537_v29 = vpack.c.bf16 %v697_v28, %v696_v27  ;;  %v699_v31 = vld [vmem:[#allocation10 + $0x48] sm:$0xff]  ;;  %v701_v34 = vld [vmem:[#allocation10 + $0x58] sm:$0xff]  ;;  %v704_v44 = vld [vmem:[#allocation10 + $0x70] sm:$0xff] }
  0xe3   : > { %v1540_v32 = vpack.c.bf16 %v699_v31, %v698_v30  ;;  %v703_v37 = vld [vmem:[#allocation10 + $0x68] sm:$0xff]  ;;  %v786_v49 = vld [vmem:[#allocation11 + $0x10] sm:$0xff]  ;;  %v787_v51 = vld [vmem:[#allocation11 + $0x18] sm:$0xff] }
  0xe4   : > { %1493 = vmatpush3.bf16.msra.mxu1 %v1492_v36  ;;  %v702_v36 = vld [vmem:[#allocation10 + $0x60] sm:$0xff]  ;;  %v785_v48 = vld [vmem:[#allocation11 + $0x8] sm:$0xff]  ;;  %v1555_v52 = vpack.c.bf16 %v787_v51, %v786_v49  ;;  %v791_v57 = vld [vmem:[#allocation11 + $0x38] sm:$0xff] }
  0xe5   : > { %1472 = vmatpush3.bf16.msra.mxu0 %v1471_v33  ;;  %1494 = vmatprep.subr.bf16.mxu1 %v1998_v0  ;;  %v700_v33 = vld [vmem:[#allocation10 + $0x50] sm:$0xff]  ;;  %v1546_v38 = vpack.c.bf16 %v703_v37, %v702_v36  ;;  %v788_v53 = vld [vmem:[#allocation11 + $0x20] sm:$0xff]  ;;  %v793_v60 = vld [vmem:[#allocation11 + $0x48] sm:$0xff] }
  0xe6   : > { %1473 = vmatprep.subr.bf16.mxu0 %v1998_v0  ;;  %v1543_v35 = vpack.c.bf16 %v701_v34, %v700_v33  ;;  %v795_v63 = vld [vmem:[#allocation11 + $0x58] sm:$0xff]  ;;  %v797_v4 = vld [vmem:[#allocation11 + $0x68] sm:$0xff]  ;;  %v880_v15 = vld [vmem:[#allocation13 + $0x10] sm:$0xff] }
  0xe7   : > { %v882_v19 = vld [vmem:[#allocation13 + $0x20] sm:$0xff]  ;;  %v883_v20 = vld [vmem:[#allocation13 + $0x28] sm:$0xff]  ;;  %v885_v22 = vld [vmem:[#allocation13 + $0x38] sm:$0xff] }
  0xe8   : > { %1496 = vmatpush3.bf16.msra.mxu1 %v1495_v42  ;;  %v886_v24 = vld [vmem:[#allocation13 + $0x40] sm:$0xff]  ;;  %v887_v25 = vld [vmem:[#allocation13 + $0x48] sm:$0xff]  ;;  %v888_v27 = vld [vmem:[#allocation13 + $0x50] sm:$0xff] }
  0xe9   : > { %1475 = vmatpush3.bf16.msra.mxu0 %v1474_v39  ;;  %1497 = vmatprep.subr.bf16.mxu1 %v1998_v0  ;;  %v1134_v39 = vld [vmem:[%s2477_s7 + $0x1] ss:$0 sm:$0xff]  ;;  %v889_v28 = vld [vmem:[#allocation13 + $0x58] sm:$0xff]  ;;  %v890_v30 = vld [vmem:[#allocation13 + $0x60] sm:$0xff] }
  0xea   : > { %1476 = vmatprep.subr.bf16.mxu0 %v1998_v0  ;;  %v891_v31 = vld [vmem:[#allocation13 + $0x68] sm:$0xff]  ;;  %v1136_v33 = vld [vmem:[%s2477_s7 + $0x3] ss:$0 sm:$0xff] }
  0xec   : > { %1499 = vmatpush3.bf16.msra.mxu1 %v1498_v46 }
  0xed   : > { %1478 = vmatpush3.bf16.msra.mxu0 %v1477_v45  ;;  %1500 = vmatprep.subr.bf16.mxu1 %v1998_v0  ;;  %v705_v45 = vld [vmem:[#allocation10 + $0x78] sm:$0xff] }
  0xee   : > { %1503 = vmatprep.subr.bf16.mxu0 %v1998_v0  ;;  %v1549_v46 = vpack.c.bf16 %v705_v45, %v704_v44  ;;  %v1138_v45 = vld [vmem:[%s2477_s7 + $0x5] ss:$0 sm:$0xff] }
  0xf0   : > { %1278 = vmatmul.mubr.f32.vlgmr.msra.gmra.mrb[0].mxu0 %v408_v47  ;;  %1502 = vmatpush3.bf16.msra.mxu1 %v1501_v50  ;;  %v784_v47 = vld [vmem:[#allocation11] sm:$0xff] }
  0xf1   : > { %1347 = vmatprep.mubr.msk.f32.mxu0 %vm1999_vm0, %v2000_v1  ;;  %1527 = vmatprep.subr.bf16.mxu1 %v1998_v0  ;;  %v1552_v50 = vpack.c.bf16 %v785_v48, %v784_v47 }
  0xf2   : > { %1505 = vmatpush3.bf16.msra.mxu0 %v1504_v54  ;;  %v789_v54 = vld [vmem:[#allocation11 + $0x28] sm:$0xff] }
  0xf3   : > { %1506 = vmatprep.subr.bf16.mxu0 %v1998_v0  ;;  %v1558_v55 = vpack.c.bf16 %v789_v54, %v788_v53 }
  0xf6   : > { %1508 = vmatpush3.bf16.msra.mxu0 %v1507_v56  ;;  %v790_v56 = vld [vmem:[#allocation11 + $0x30] sm:$0xff] }
  0xf7   : > { %1509 = vmatprep.subr.bf16.mxu0 %v1998_v0  ;;  %v1561_v58 = vpack.c.bf16 %v791_v57, %v790_v56 }
  0xfa   : > { %1511 = vmatpush3.bf16.msra.mxu0 %v1510_v59  ;;  %v792_v59 = vld [vmem:[#allocation11 + $0x40] sm:$0xff] }
  0xfb   : > { %1512 = vmatprep.subr.bf16.mxu0 %v1998_v0  ;;  %v1564_v61 = vpack.c.bf16 %v793_v60, %v792_v59 }
  0xfe   : > { %1514 = vmatpush3.bf16.msra.mxu0 %v1513_v62  ;;  %v794_v62 = vld [vmem:[#allocation11 + $0x50] sm:$0xff] }
  0xff   : > { %1515 = vmatprep.subr.bf16.mxu0 %v1998_v0  ;;  %v1567_v2 = vpack.c.bf16 %v795_v63, %v794_v62 }
 0x102   : > { %1517 = vmatpush3.bf16.msra.mxu0 %v1516_v3  ;;  %v796_v3 = vld [vmem:[#allocation11 + $0x60] sm:$0xff] }
 0x103   : > { %1518 = vmatprep.subr.bf16.mxu0 %v1998_v0  ;;  %v1570_v5 = vpack.c.bf16 %v797_v4, %v796_v3 }
 0x106   : > { %1520 = vmatpush3.bf16.msra.mxu0 %v1519_v6  ;;  %v1135_v6 = vld [vmem:[%s2477_s7 + $0x2] ss:$0 sm:$0xff] }
 0x107   : > { %1521 = vmatprep.subr.bf16.mxu0 %v1998_v0 }
 0x10a   : > { %1523 = vmatpush3.bf16.msra.mxu0 %v1522_v9 }
 0x10b   : > { %1524 = vmatprep.subr.bf16.mxu0 %v1998_v0 }
 0x10e   : > { %1526 = vmatpush3.bf16.msra.mxu0 %v1525_v17  ;;  %v881_v17 = vld [vmem:[#allocation13 + $0x18] sm:$0xff] }
 0x10f   : > { %1551 = vmatprep.subr.bf16.mxu0 %v1998_v0  ;;  %v1579_v18 = vpack.c.bf16 %v881_v17, %v880_v15 }
 0x1c3   : > { %v498_v11 = vpop.f32.mrb[0].mxu0 }
 0x1c4   : > { %v499_v12 = vadd.f32 %v1133_v10, %v498_v11  ;;  %v1279_v13 = vpop.f32.mrb[1].mxu0  ;;  %v798_v10 = vld [vmem:[#allocation11 + $0x70] sm:$0xff]  ;;  %v799_v11 = vld [vmem:[#allocation11 + $0x78] sm:$0xff] }
 0x1c5   : > { %v878_v13 = vld [vmem:[#allocation13] sm:$0xff] }
 0x1c6   : > { %v502_v14 = vmax.f32 %v499_v12, 0.0  ;;  %v1573_v12 = vpack.c.bf16 %v799_v11, %v798_v10 }
 0x1c8   : > { %1313 = vmatmul.mubr.f32.vlgmr.msra.gmra.mrb[0].mxu1 %v502_v14  ;;  %v879_v14 = vld [vmem:[#allocation13 + $0x8] sm:$0xff] }
 0x1c9   : > { %1382 = vmatprep.mubr.msk.f32.mxu1 %vm1999_vm0, %v2000_v1  ;;  %1529 = vmatpush3.bf16.msra.mxu1 %v1528_v21  ;;  %v1576_v16 = vpack.c.bf16 %v879_v14, %v878_v13  ;;  %v1582_v21 = vpack.c.bf16 %v883_v20, %v882_v19 }
 0x1ca   : > { %1530 = vmatprep.subr.bf16.mxu1 %v1998_v0 }
 0x1cd   : > { %1532 = vmatpush3.bf16.msra.mxu1 %v1531_v23 }
 0x1ce   : > { %1533 = vmatprep.subr.bf16.mxu1 %v1998_v0 }
 0x1d1   : > { %1535 = vmatpush3.bf16.msra.mxu1 %v1534_v26  ;;  %v1588_v26 = vpack.c.bf16 %v887_v25, %v886_v24 }
 0x1d2   : > { %1536 = vmatprep.subr.bf16.mxu1 %v1998_v0 }
 0x1d5   : > { %1538 = vmatpush3.bf16.msra.mxu1 %v1537_v29  ;;  %v1591_v29 = vpack.c.bf16 %v889_v28, %v888_v27 }
 0x1d6   : > { %1539 = vmatprep.subr.bf16.mxu1 %v1998_v0 }
 0x1d9   : > { %1541 = vmatpush3.bf16.msra.mxu1 %v1540_v32  ;;  %v1594_v32 = vpack.c.bf16 %v891_v31, %v890_v30 }
 0x1da   : > { %1542 = vmatprep.subr.bf16.mxu1 %v1998_v0 }
 0x1dd   : > { %1544 = vmatpush3.bf16.msra.mxu1 %v1543_v35 }
 0x1de   : > { %1545 = vmatprep.subr.bf16.mxu1 %v1998_v0 }
 0x1e1   : > { %1547 = vmatpush3.bf16.msra.mxu1 %v1546_v38  ;;  %v892_v38 = vld [vmem:[#allocation13 + $0x70] sm:$0xff] }
 0x1e2   : > { %1548 = vmatprep.subr.bf16.mxu1 %v1998_v0 }
 0x1e5   : > { %1550 = vmatpush3.bf16.msra.mxu1 %v1549_v46 }
 0x1e6   : > { %1575 = vmatprep.subr.bf16.mxu1 %v1998_v0 }
 0x29b   : > { %v592_v40 = vpop.f32.mrb[0].mxu1 }
 0x29c   : > { %v593_v41 = vadd.f32 %v1134_v39, %v592_v40  ;;  %v1314_v42 = vpop.f32.mrb[1].mxu1  ;;  %v893_v39 = vld [vmem:[#allocation13 + $0x78] sm:$0xff] }
 0x29d   : > { %v1597_v40 = vpack.c.bf16 %v893_v39, %v892_v38 }
 0x29e   : > { %v596_v43 = vmax.f32 %v593_v41, 0.0  ;;  %v1137_v41 = vld [vmem:[%s2477_s7 + $0x4] ss:$0 sm:$0xff] }
 0x2a0   : > { %1348 = vmatmul.mubr.f32.vlgmr.msra.gmra.mrb[2].mxu0 %v596_v43 }
 0x2a1   : > { %1417 = vmatprep.mubr.msk.f32.mxu0 %vm1999_vm0, %v2000_v1  ;;  %1553 = vmatpush3.bf16.msra.mxu0 %v1552_v50 }
 0x2a2   : > { %1554 = vmatprep.subr.bf16.mxu0 %v1998_v0 }
 0x2a5   : > { %1556 = vmatpush3.bf16.msra.mxu0 %v1555_v52 }
 0x2a6   : > { %1557 = vmatprep.subr.bf16.mxu0 %v1998_v0 }
 0x2a9   : > { %1559 = vmatpush3.bf16.msra.mxu0 %v1558_v55 }
 0x2aa   : > { %1560 = vmatprep.subr.bf16.mxu0 %v1998_v0 }
 0x2ad   : > { %1562 = vmatpush3.bf16.msra.mxu0 %v1561_v58 }
 0x2ae   : > { %1563 = vmatprep.subr.bf16.mxu0 %v1998_v0 }
 0x2b1   : > { %1565 = vmatpush3.bf16.msra.mxu0 %v1564_v61 }
 0x2b2   : > { %1566 = vmatprep.subr.bf16.mxu0 %v1998_v0 }
 0x2b5   : > { %1568 = vmatpush3.bf16.msra.mxu0 %v1567_v2 }
 0x2b6   : > { %1569 = vmatprep.subr.bf16.mxu0 %v1998_v0 }
 0x2b9   : > { %1571 = vmatpush3.bf16.msra.mxu0 %v1570_v5 }
 0x2ba   : > { %1572 = vmatprep.subr.bf16.mxu0 %v1998_v0 }
 0x2bd   : > { %1574 = vmatpush3.bf16.msra.mxu0 %v1573_v12 }
 0x373   : > { %v686_v7 = vpop.f32.mrb[2].mxu0 }
 0x374   : > { %v687_v8 = vadd.f32 %v1135_v6, %v686_v7  ;;  %v1349_v9 = vpop.f32.mrb[3].mxu0 }
 0x376   : > { %1383 = vmatmul.mubr.f32.vlgmr.msra.gmra.mrb[2].mxu1 %v687_v8 }
 0x377   : > { %1452 = vmatprep.mubr.msk.f32.mxu1 %vm1999_vm0, %v2000_v1  ;;  %1577 = vmatpush3.bf16.msra.mxu1 %v1576_v16  ;;  %v884_v1 = vld [vmem:[#allocation13 + $0x30] sm:$0xff] }
 0x378   : > { %1578 = vmatprep.subr.bf16.mxu1 %v1998_v0  ;;  %v1585_v23 = vpack.c.bf16 %v885_v22, %v884_v1 }
 0x37b   : > { %1580 = vmatpush3.bf16.msra.mxu1 %v1579_v18 }
 0x37c   : > { %1581 = vmatprep.subr.bf16.mxu1 %v1998_v0 }
 0x37f   : > { %1583 = vmatpush3.bf16.msra.mxu1 %v1582_v21 }
 0x380   : > { %1584 = vmatprep.subr.bf16.mxu1 %v1998_v0 }
 0x383   : > { %1586 = vmatpush3.bf16.msra.mxu1 %v1585_v23 }
 0x384   : > { %1587 = vmatprep.subr.bf16.mxu1 %v1998_v0 }
 0x387   : > { %1589 = vmatpush3.bf16.msra.mxu1 %v1588_v26 }
 0x388   : > { %1590 = vmatprep.subr.bf16.mxu1 %v1998_v0 }
 0x38b   : > { %1592 = vmatpush3.bf16.msra.mxu1 %v1591_v29 }
 0x38c   : > { %1593 = vmatprep.subr.bf16.mxu1 %v1998_v0 }
 0x38f   : > { %1595 = vmatpush3.bf16.msra.mxu1 %v1594_v32 }
 0x390   : > { %1596 = vmatprep.subr.bf16.mxu1 %v1998_v0 }
 0x393   : > { %1598 = vmatpush3.bf16.msra.mxu1 %v1597_v40 }
 0x449   : > { %v779_v34 = vpop.f32.mrb[2].mxu1 }
 0x44a   : > { %v780_v35 = vadd.f32 %v1136_v33, %v779_v34  ;;  %v1384_v36 = vpop.f32.mrb[3].mxu1 }
 0x44c   : > { %v783_v37 = vmax.f32 %v780_v35, 0.0 }
 0x44e   : > { %1418 = vmatmul.mubr.f32.vlgmr.msra.gmra.mrb[4].mxu0 %v783_v37 }
 0x521   : > { %v873_v0 = vpop.f32.mrb[4].mxu0 }
 0x522   : > { %v874_v42 = vadd.f32 %v1137_v41, %v873_v0  ;;  %v1419_v43 = vpop.f32.mrb[5].mxu0 }
 0x524   : > { %v877_v44 = vmax.f32 %v874_v42, 0.0 }
 0x526   : > { %1453 = vmatmul.mubr.f32.vlgmr.msra.gmra.mrb[4].mxu1 %v877_v44 }
 0x5f9   : > { %v967_v46 = vpop.f32.mrb[4].mxu1 }
 0x5fa   : > { %v968_v47 = vadd.f32 %v1138_v45, %v967_v46  ;;  %v1454_v48 = vpop.f32.mrb[5].mxu1 }
 0x5fc   : > { %971 = vst [vmem:[%s407_s9] sm:$0xff] %v968_v47 }
 0x5fd   : > { %1922 = shalt.err (!%p1919_p3)
}
 0x5fe   : > { %s1923_s1 = scalar_lea.hbm %s2426_s17, 128  ;;  %s1927_s14 = scalar_lea.hbm %s2478_s8, 256 }
 0x5ff   : > { %p1924_p4 = scmp.ne.s32.totalorder %s2426_s17, %s1923_s1  ;;  %p1928_p8 = scmp.lt.u32.totalorder %s2426_s17, %s2478_s8 }
 0x600   : > { %p1929_p5 = scmp.lt.u32.totalorder %s1927_s14, %s1923_s1  ;;  %p1931_p6 = scmp.lt.u32.totalorder %s1923_s1, %s2426_s17 }
 0x601   : > { %p1925_p10 = pnand %p1924_p4, %p2500_p9 }
 0x602   : > { %p1930_p7 = por %p1929_p5, %p1928_p8 }
 0x603   : > { %p1926_p11 = pneg %p1925_p10 }
 0x604   : > { %p1932_p12 = por %p1931_p6, %p1930_p7 }
 0x606   : > { %p1933_p1 = pnand %p1932_p12, %p1926_p11 }
 0x608   : > { %1936 = shalt.err (!%p1933_p1)
}
 0x609   : > { %1625 = dma.vmem_to_hbm [thread:$0]  (%p2500_p9), %s2428_s21, 128, %s2426_s17, %s973_s13  }
 0x60a PF: > { %s998_s19 = sand.u32 1, %s1975_s27   ;;  %p2501_p13 = scmp.ne.s32.totalorder %s2491_s22, 0 }
 0x60b   : > { %p2502_p0 = scmp.ge.s32.totalorder %s1987_s30, 2  ;;  %s999_s15 = scalar_lea.sflag [#allocation4], %s998_s19 }
 0x60d   : > { %p1651_p2 = pnand %p2502_p0, %p2501_p13 }
 0x60f   : > { %1970 = dma.done.wait (!%p1651_p2), %s999_s15, 128  }
 0x610   : > { %1972 = vsyncadd (!%p1651_p2), %s999_s15, 4294967168  ;;  %p24_p3 = scmp.ge.s32.totalorder %s2241_s23, 4   ;;  %s2503_s27 = smov %s1979_s28 }
 0x611   : > { %s2504_s28 = smov %s1983_s29  ;;  %s2505_s29 = smov %s2252_s18 }
 0x612   : > { %s2506_s30 = smov %s2241_s23  ;;  %26 = sbr.rel (!%p24_p3) target bundleno = 10 (0xa), region = 121 }
 0x619   :  { %1004 = vsyncpa [#allocation3], 1 }
 0x61a   :  { %1006 = vsyncpa [#allocation3 + $0x1], 1 }
 0x61b   :  { %1007 = vsyncpa [#allocation6], 1 }
 0x61c   :  { %1008 = vsyncpa [#allocation9], 1 }
 0x61d   :  { %1009 = vsyncpa [#allocation12], 1 }
 0x61e   :  { %1010 = vsyncpa [#allocation4], 1 }
 0x61f   :  { %1012 = vsyncpa [#allocation4 + $0x1], 1 }

// kernel: tpu_custom_call.1
= control target key start
LH: loop header
LB: loop body
LE: loop exit
PB: predicated region body
PF: predicated region fallthrough
CT: control target
= control target key end

     0   :  { %s2470_s0 = inlined_call_operand.hbm [shape: f32[16,128], index: 0, kind: input, shape index: {}]   ;;  %s2471_s1 = inlined_call_operand.hbm [shape: f32[128,128], index: 1, kind: input, shape index: {}]   ;;  %s2472_s2 = inlined_call_operand.hbm [shape: f32[128,128], index: 2, kind: input, shape index: {}]   ;;  %s2473_s3 = inlined_call_operand.hbm [shape: f32[128,128], index: 3, kind: input, shape index: {}]   ;;  %s2474_s4 = inlined_call_operand.hbm [shape: f32[128,128], index: 4, kind: input, shape index: {}]   ;;  %s2475_s5 = inlined_call_operand.hbm [shape: f32[128,128], index: 5, kind: input, shape index: {}]   ;;  %s2476_s6 = inlined_call_operand.hbm [shape: f32[128,128], index: 6, kind: input, shape index: {}]   ;;  %s2477_s7 = inlined_call_operand.vmem [shape: f32[1,768], index: 7, kind: input, shape index: {}]   ;;  %s2478_s8 = inlined_call_operand.hbm [shape: f32[16,128], index: 8, kind: output, shape index: {}]  }
   0x1   :  { %2482 = sst [smem:[#allocation20_spill]] %s2471_s1 }
   0x2   :  { %13 = vsyncpa [#allocation3], 0 }
   0x3   :  { %15 = vsyncpa [#allocation3 + $0x1], 0 }
   0x4   :  { %16 = vsyncpa [#allocation6], 0 }
   0x5   :  { %17 = vsyncpa [#allocation9], 0 }
   0x6   :  { %18 = vsyncpa [#allocation12], 0 }
   0x7   :  { %19 = vsyncpa [#allocation4], 0 }
   0x8   :  { %21 = vsyncpa [#allocation4 + $0x1], 0  ;;  %s2047_s27 = smov 0   ;;  %s2049_s28 = smov 0  }
   0x9   :  { %s2051_s29 = smov 0   ;;  %s2053_s30 = smov 0  }
   0xa LB: > { %s1989_s9 = smov [#allocation5]   ;;  %s2068_s11 = sadd.s32 4294967295, %s1987_s30   ;;  %s1987_s30 = sphi %s2053_s30, %s2506_s30   ;;  %s1983_s29 = sphi %s2051_s29, %s2505_s29   ;;  %s1979_s28 = sphi %s2049_s28, %s2504_s28   ;;  %s1975_s27 = sphi %s2047_s27, %s2503_s27  }
   0xb   : > { %s243_s10 = sshll.u32 %s1989_s9, 4  ;;  %p1114_p0 = scmp.ge.s32.totalorder %s1987_s30, 1  ;;  %s2073_s10 = int_to_ptr.vmem [resolvable:$true] %s243_s10 }
   0xc   : > { %p2479_p1 = scmp.eq.s32.totalorder %s2068_s11, 0  ;;  %p231_p2 = scmp.lt.s32.totalorder %s1987_s30, 3 }
   0xd   : > { %s1990_s13 = smov [#allocation8]   ;;  %s1991_s16 = smov [#allocation11]  }
   0xe   : > { %p2075_p3 = pnand %p1114_p0, %p231_p2  ;;  %s269_s14 = sshll.u32 %s1990_s13, 4  ;;  %s2088_s14 = int_to_ptr.vmem [resolvable:$true] %s269_s14 }
   0xf   : > { %s295_s17 = sshll.u32 %s1991_s16, 4  ;;  %s2485_s1 = sld [smem:[#allocation20_spill]]  ;;  %s2090_s17 = int_to_ptr.vmem [resolvable:$true] %s295_s17 }
  0x10   : > { %s2483_s12 = scalar_select %p2075_p3, 1, 0 }
  0x11   : > { %p1627_p5 = pneg %p2075_p3 }
  0x13   : > { %p2084_p6 = pnand %p1627_p5, %p2479_p1 }
  0x15   : > { %s1711_s20 = scalar_lea.hbm %s2485_s1, 2048  ;;  %p2100_p8 = pneg %p2084_p6 }
  0x16   : > { %p1712_p7 = scmp.ne.s32.totalorder %s2485_s1, %s1711_s20  ;;  %p1718_p11 = scmp.lt.u32.totalorder %s1711_s20, %s2485_s1 }
  0x18   : > { %p1714_p9 = pnand %p2100_p8, %p1712_p7 }
  0x1a   : > { %p1715_p10 = pneg %p1714_p9 }
  0x1c   : > { %p1720_p12 = pnand %p1718_p11, %p1715_p10 }
  0x1e   : > { %1723 = shalt.err (!%p1720_p12)
}
  0x1f   : > { %s1724_s26 = scalar_lea.vmem %s2073_s10, 2048  ;;  %p1732_p5 = scmp.lt.s32.totalorder %s2073_s10, %s2073_s10 }
  0x20   : > { %p1725_p13 = scmp.ne.s32.totalorder %s2073_s10, %s1724_s26  ;;  %p1733_p4 = scmp.lt.s32.totalorder %s1724_s26, %s1724_s26 }
  0x22   : > { %p1727_p0 = pnand %p1725_p13, %p2100_p8  ;;  %p1734_p7 = por %p1733_p4, %p1732_p5 }
  0x24   : > { %p1728_p2 = pneg %p1727_p0 }
  0x26   : > { %p1735_p9 = pnand %p1734_p7, %p1728_p2 }
  0x28   : > { %1738 = shalt.err (!%p1735_p9)
}
  0x29   : > { %s1992_s9 = smov 128   ;;  %s1993_s13 = smov 8  }
  0x2a   : > { %1630 = dma.hbm_to_vmem [thread:$0]  (!%p2084_p6), %s2485_s1, 2048, %s2073_s10, [#allocation6], %s1992_s9, %s1992_s9, %s1993_s13  }
  0x2b   : > { %s1739_s21 = scalar_lea.hbm %s2473_s3, 2048 }
  0x2c   : > { %p1740_p4 = scmp.ne.s32.totalorder %s2473_s3, %s1739_s21  ;;  %p1746_p12 = scmp.lt.u32.totalorder %s1739_s21, %s2473_s3 }
  0x2e   : > { %p1742_p10 = pnand %p1740_p4, %p2100_p8 }
  0x30   : > { %p1743_p11 = pneg %p1742_p10 }
  0x32   : > { %p1748_p13 = pnand %p1746_p12, %p1743_p11 }
  0x34   : > { %1751 = shalt.err (!%p1748_p13)
}
  0x35   : > { %s1752_s10 = scalar_lea.vmem %s2088_s14, 2048  ;;  %p1760_p7 = scmp.lt.s32.totalorder %s2088_s14, %s2088_s14 }
  0x36   : > { %p1753_p0 = scmp.ne.s32.totalorder %s2088_s14, %s1752_s10  ;;  %p1761_p9 = scmp.lt.s32.totalorder %s1752_s10, %s1752_s10 }
  0x38   : > { %p1755_p2 = pnand %p1753_p0, %p2100_p8  ;;  %p1762_p4 = por %p1761_p9, %p1760_p7 }
  0x3a   : > { %p1756_p5 = pneg %p1755_p2 }
  0x3c   : > { %p1763_p10 = pnand %p1762_p4, %p1756_p5 }
  0x3e   : > { %1766 = shalt.err (!%p1763_p10)
}
  0x3f   : > { %1636 = dma.hbm_to_vmem [thread:$0]  (!%p2084_p6), %s2473_s3, 2048, %s2088_s14, [#allocation9], %s1992_s9, %s1992_s9, %s1993_s13  }
  0x40   : > { %s1767_s21 = scalar_lea.hbm %s2475_s5, 2048 }
  0x41   : > { %p1768_p11 = scmp.ne.s32.totalorder %s2475_s5, %s1767_s21  ;;  %p1774_p0 = scmp.lt.u32.totalorder %s1767_s21, %s2475_s5 }
  0x43   : > { %p1770_p12 = pnand %p1768_p11, %p2100_p8 }
  0x45   : > { %p1771_p13 = pneg %p1770_p12 }
  0x47   : > { %p1776_p2 = pnand %p1774_p0, %p1771_p13 }
  0x49   : > { %1779 = shalt.err (!%p1776_p2)
}
  0x4a   : > { %s1780_s14 = scalar_lea.vmem %s2090_s17, 2048  ;;  %p1788_p4 = scmp.lt.s32.totalorder %s2090_s17, %s2090_s17 }
  0x4b   : > { %p1781_p5 = scmp.ne.s32.totalorder %s2090_s17, %s1780_s14  ;;  %p1789_p10 = scmp.lt.s32.totalorder %s1780_s14, %s1780_s14 }
  0x4d   : > { %p1783_p7 = pnand %p1781_p5, %p2100_p8  ;;  %p1790_p11 = por %p1789_p10, %p1788_p4 }
  0x4f   : > { %p1784_p9 = pneg %p1783_p7 }
  0x51   : > { %p1791_p12 = pnand %p1790_p11, %p1784_p9 }
  0x53   : > { %1794 = shalt.err (!%p1791_p12)
}
  0x54   : > { %1642 = dma.hbm_to_vmem [thread:$0]  (!%p2084_p6), %s2475_s5, 2048, %s2090_s17, [#allocation12], %s1992_s9, %s1992_s9, %s1993_s13  }
  0x55   : > { %s1994_s18 = smov [#allocation7]   ;;  %s1995_s20 = smov [#allocation10]  }
  0x56   : > { %s256_s19 = sshll.u32 %s1994_s18, 4  ;;  %s282_s21 = sshll.u32 %s1995_s20, 4  ;;  %s257_s19 = int_to_ptr.vmem [resolvable:$true] %s256_s19  ;;  %s283_s21 = int_to_ptr.vmem [resolvable:$true] %s282_s21 }
  0x57   : > { %s1795_s25 = scalar_lea.hbm %s2472_s2, 2048 }
  0x58   : > { %p1796_p13 = scmp.ne.s32.totalorder %s2472_s2, %s1795_s25  ;;  %p1802_p5 = scmp.lt.u32.totalorder %s1795_s25, %s2472_s2 }
  0x5a   : > { %p1798_p0 = pnand %p1796_p13, %p2100_p8 }
  0x5c   : > { %p1799_p2 = pneg %p1798_p0 }
  0x5e   : > { %p1804_p7 = pnand %p1802_p5, %p1799_p2 }
  0x60   : > { %1807 = shalt.err (!%p1804_p7)
}
  0x61   : > { %s1808_s17 = scalar_lea.vmem %s257_s19, 2048  ;;  %p1816_p11 = scmp.lt.s32.totalorder %s257_s19, %s257_s19 }
  0x62   : > { %p1809_p9 = scmp.ne.s32.totalorder %s257_s19, %s1808_s17  ;;  %p1817_p12 = scmp.lt.s32.totalorder %s1808_s17, %s1808_s17 }
  0x64   : > { %p1811_p4 = pnand %p1809_p9, %p2100_p8  ;;  %p1818_p1 = por %p1817_p12, %p1816_p11 }
  0x66   : > { %p1812_p10 = pneg %p1811_p4 }
  0x68   : > { %p1819_p3 = pnand %p1818_p1, %p1812_p10 }
  0x6a   : > { %1822 = shalt.err (!%p1819_p3)
}
  0x6b   : > { %1633 = dma.hbm_to_vmem [thread:$0]  (!%p2084_p6), %s2472_s2, 2048, %s257_s19, [#allocation6], %s1992_s9, %s1992_s9, %s1993_s13  }
  0x6c   : > { %s1823_s22 = scalar_lea.hbm %s2474_s4, 2048 }
  0x6d   : > { %p1824_p1 = scmp.ne.s32.totalorder %s2474_s4, %s1823_s22  ;;  %p1830_p0 = scmp.lt.u32.totalorder %s1823_s22, %s2474_s4 }
  0x6f   : > { %p1826_p3 = pnand %p1824_p1, %p2100_p8 }
  0x71   : > { %p1827_p13 = pneg %p1826_p3 }
  0x73   : > { %p1832_p2 = pnand %p1830_p0, %p1827_p13 }
  0x75   : > { %1835 = shalt.err (!%p1832_p2)
}
  0x76   : > { %s1836_s10 = scalar_lea.vmem %s283_s21, 2048  ;;  %p1844_p4 = scmp.lt.s32.totalorder %s283_s21, %s283_s21 }
  0x77   : > { %p1837_p5 = scmp.ne.s32.totalorder %s283_s21, %s1836_s10  ;;  %p1845_p10 = scmp.lt.s32.totalorder %s1836_s10, %s1836_s10 }
  0x79   : > { %p1839_p7 = pnand %p1837_p5, %p2100_p8  ;;  %p1846_p11 = por %p1845_p10, %p1844_p4 }
  0x7b   : > { %p1840_p9 = pneg %p1839_p7 }
  0x7d   : > { %p1847_p12 = pnand %p1846_p11, %p1840_p9 }
  0x7f   : > { %1850 = shalt.err (!%p1847_p12)
}
  0x80   : > { %1639 = dma.hbm_to_vmem [thread:$0]  (!%p2084_p6), %s2474_s4, 2048, %s283_s21, [#allocation9], %s1992_s9, %s1992_s9, %s1993_s13  }
  0x81   : > { %s1996_s1 = smov [#allocation13]   ;;  %s1851_s22 = scalar_lea.hbm %s2476_s6, 2048 }
  0x82   : > { %s308_s16 = sshll.u32 %s1996_s1, 4  ;;  %p1852_p1 = scmp.ne.s32.totalorder %s2476_s6, %s1851_s22  ;;  %s309_s16 = int_to_ptr.vmem [resolvable:$true] %s308_s16 }
  0x83   : > { %p1858_p0 = scmp.lt.u32.totalorder %s1851_s22, %s2476_s6 }
  0x84   : > { %p1854_p3 = pnand %p1852_p1, %p2100_p8 }
  0x86   : > { %p1855_p13 = pneg %p1854_p3 }
  0x88   : > { %p1860_p2 = pnand %p1858_p0, %p1855_p13 }
  0x8a   : > { %1863 = shalt.err (!%p1860_p2)
}
  0x8b   : > { %s1864_s21 = scalar_lea.vmem %s309_s16, 2048  ;;  %p1872_p4 = scmp.lt.s32.totalorder %s309_s16, %s309_s16 }
  0x8c   : > { %p1865_p5 = scmp.ne.s32.totalorder %s309_s16, %s1864_s21  ;;  %p1873_p10 = scmp.lt.s32.totalorder %s1864_s21, %s1864_s21 }
  0x8e   : > { %p1867_p7 = pnand %p1865_p5, %p2100_p8  ;;  %p1874_p11 = por %p1873_p10, %p1872_p4 }
  0x90   : > { %p1868_p9 = pneg %p1867_p7 }
  0x92   : > { %p1875_p12 = pnand %p1874_p11, %p1868_p9 }
  0x94   : > { %1878 = shalt.err (!%p1875_p12)
}
  0x95   : > { %1645 = dma.hbm_to_vmem [thread:$0]  (!%p2084_p6), %s2476_s6, 2048, %s309_s16, [#allocation12], %s1992_s9, %s1992_s9, %s1993_s13  }
  0x96   : > { %s1113_s15 = sadd.s32 4294967294, %s1987_s30   ;;  %s2241_s23 = sadd.s32 1, %s1987_s30  }
  0x97   : > { %s31_s17 = ssub.s32 %s1987_s30, %s2241_s23  ;;  %s34_s1 = sadd.s32 1, %s1983_s29 }
  0x98   : > { %p32_p8 = scmp.eq.s32.totalorder %s31_s17, 0  ;;  %p41_p1 = scmp.ne.s32.totalorder %s1983_s29, %s1979_s28 }
  0x99   : > { %p42_p3 = scmp.eq.s32.totalorder %s1987_s30, 0  ;;  %p47_p13 = scmp.ne.s32.totalorder %s1979_s28, %s1975_s27 }
  0x9a   : > { %s2252_s18 = scalar_select %p32_p8, %s1983_s29, %s34_s1  }
  0x9b   : > { %p2254_p0 = por %p42_p3, %p41_p1  ;;  %p2488_p2 = scmp.eq.s32.totalorder %s2068_s11, 0 }
  0x9c   : > { %p218_p5 = scmp.eq.s32.totalorder %s2068_s11, 1  ;;  %p224_p7 = scmp.eq.s32.totalorder %s1113_s15, 1 }
  0x9d   : > { %p2260_p6 = por %p2488_p2, %p47_p13  ;;  %p1660_p9 = scmp.lt.s32.totalorder %s1987_s30, 2 }
  0x9e   : > { %s325_s13 = sand.u32 1, %s1983_s29   ;;  %p2267_p4 = por %p218_p5, %p41_p1 }
  0x9f   : > { %p2271_p10 = por %p224_p7, %p47_p13  ;;  %s1122_s24 = sshll.u32 %s325_s13, 3 }
  0xa0   : > { %s2490_s16 = scalar_select %p2267_p4, 1, 0 }
  0xa1   : > { %s2491_s22 = scalar_select %p2271_p10, 1, 0 }
  0xa2   : > { %s1123_s25 = sshll.u32 %s1987_s30, 7  ;;  %s329_s10 = scalar_lea.vmem [#allocation2], %s1122_s24 }
  0xa3   : > { %s2279_s21 = scalar_lea.hbm %s2470_s0, %s1123_s25  ;;  %s336_s19 = sshll.u32 %s329_s10, 4  ;;  %s2281_s19 = int_to_ptr.vmem [resolvable:$true] %s336_s19 }
  0xa4   : > { %p2285_p11 = pnand %p1660_p9, %p2254_p0  ;;  %s326_s17 = scalar_lea.sflag [#allocation3], %s325_s13 }
  0xa5   : > { %s1879_s1 = scalar_lea.hbm %s2279_s21, 128  ;;  %s1884_s26 = scalar_lea.hbm %s2470_s0, 256 }
  0xa6   : > { %p1880_p12 = scmp.ne.s32.totalorder %s2279_s21, %s1879_s1  ;;  %p1881_p8 = pneg %p2285_p11 }
  0xa7   : > { %p1885_p13 = scmp.lt.u32.totalorder %s2279_s21, %s2470_s0  ;;  %p1886_p0 = scmp.lt.u32.totalorder %s1884_s26, %s1879_s1 }
  0xa8   : > { %p1882_p1 = pnand %p1881_p8, %p1880_p12  ;;  %p1888_p5 = scmp.lt.u32.totalorder %s1879_s1, %s2279_s21 }
  0xa9   : > { %p1887_p2 = por %p1886_p0, %p1885_p13 }
  0xaa   : > { %p1883_p3 = pneg %p1882_p1 }
  0xab   : > { %p1889_p7 = por %p1888_p5, %p1887_p2 }
  0xad   : > { %p1890_p9 = pnand %p1889_p7, %p1883_p3 }
  0xaf   : > { %1893 = shalt.err (!%p1890_p9)
}
  0xb0   : > { %s1894_s13 = scalar_lea.vmem %s2281_s19, 128  ;;  %s1997_s10 = smov [#allocation2]  }
  0xb1   : > { %p1895_p12 = scmp.ne.s32.totalorder %s2281_s19, %s1894_s13  ;;  %s1899_s24 = sshll.u32 %s1997_s10, 4  ;;  %s1900_s24 = int_to_ptr.vmem [resolvable:$false] %s1899_s24 }
  0xb2   : > { %s1901_s25 = scalar_lea.vmem %s1900_s24, 256  ;;  %p1902_p4 = scmp.lt.s32.totalorder %s2281_s19, %s1900_s24 }
  0xb3   : > { %p1897_p1 = pnand %p1895_p12, %p1881_p8  ;;  %p1903_p13 = scmp.lt.s32.totalorder %s1901_s25, %s1894_s13 }
  0xb5   : > { %p1898_p10 = pneg %p1897_p1  ;;  %p1904_p0 = por %p1903_p13, %p1902_p4 }
  0xb7   : > { %p1905_p2 = pnand %p1904_p0, %p1898_p10 }
  0xb9   : > { %1908 = shalt.err (!%p1905_p2)
}
  0xba   : > { %1649 = dma.hbm_to_vmem [thread:$0]  (!%p2285_p11), %s2279_s21, 128, %s2281_s19, %s326_s17  }
  0xbb   : > { %p2493_p3 = scmp.ne.s32.totalorder %s2483_s12, 0 }
  0xbc   : > { %s2317_s1 = sand.u32 (!%p2493_p3), 1, %s1979_s28  }
  0xbd   : > { %345 = sbr.rel (%p2493_p3) target bundleno = 1546 (0x60a), region = 52  ;;  %s1125_s26 = sshll.u32 (!%p2493_p3), %s2317_s1, 3 }
  0xbe   : > { %s348_s20 = scalar_lea.sflag (!%p2493_p3), [#allocation3], %s2317_s1  ;;  %s2323_s14 = scalar_lea.vmem (!%p2493_p3), [#allocation2], %s1125_s26 }
  0xc4   : > { %1954 = dma.done.wait (%p2260_p6), %s348_s20, 128  }
  0xc5   : > { %1956 = vsyncadd (%p2260_p6), %s348_s20, 4294967168  ;;  %p2494_p4 = scmp.eq.s32.totalorder %s2068_s11, 0 }
  0xc7   : > { %1958 = dma.done.wait (%p2494_p4), [#allocation6], 4096   ;;  %p2495_p10 = pmov %p2494_p4 }
  0xc8   : > { %p2496_p11 = pmov %p2494_p4 }
  0xc9   : > { %1960 = vsyncadd (%p2495_p10), [#allocation6], 4294963200 }
  0xca   : > { %1962 = dma.done.wait (%p2496_p11), [#allocation9], 4096   ;;  %p2497_p8 = pmov %p2494_p4 }
  0xcb   : > { %p2498_p5 = pmov %p2494_p4 }
  0xcc   : > { %1964 = vsyncadd (%p2497_p8), [#allocation9], 4294963200 }
  0xcd   : > { %1966 = dma.done.wait (%p2498_p5), [#allocation12], 4096   ;;  %p2499_p7 = pmov %p2494_p4 }
  0xce   : > { %v1998_v0 = vmov 0.0|0.0   ;;  %vm1999_vm0 = vmmov 0   ;;  %v2000_v1 = vmov 0.0   ;;  %v409_v2 = vld [vmem:[#allocation5] sm:$0xff]  ;;  %v410_v3 = vld [vmem:[#allocation5 + $0x8] sm:$0xff]  ;;  %v411_v4 = vld [vmem:[#allocation5 + $0x10] sm:$0xff] }
  0xcf   : > { %1968 = vsyncadd (%p2499_p7), [#allocation12], 4294963200  ;;  %1455 = vmatprep.subr.bf16.mxu0 %v1998_v0  ;;  %1277 = vmatprep.mubr.msk.f32.mxu0 %vm1999_vm0, %v2000_v1  ;;  %v1456_v5 = vpack.c.bf16 %v410_v3, %v409_v2  ;;  %v412_v6 = vld [vmem:[#allocation5 + $0x18] sm:$0xff]  ;;  %v413_v8 = vld [vmem:[#allocation5 + $0x20] sm:$0xff]  ;;  %s1140_s12 = sshll.u32 %s2068_s11, 7  ;;  %s407_s9 = scalar_lea.vmem [#allocation14], %s1125_s26 }
  0xd0   : > { %1479 = vmatprep.subr.bf16.mxu1 %v1998_v0  ;;  %1312 = vmatprep.mubr.msk.f32.mxu1 %vm1999_vm0, %v2000_v1  ;;  %v1459_v7 = vpack.c.bf16 %v412_v6, %v411_v4  ;;  %v414_v9 = vld [vmem:[#allocation5 + $0x28] sm:$0xff]  ;;  %v503_v10 = vld [vmem:[#allocation7] sm:$0xff]  ;;  %v505_v12 = vld [vmem:[#allocation7 + $0x10] sm:$0xff]  ;;  %s986_s21 = sshll.u32 %s407_s9, 4  ;;  %s2426_s17 = scalar_lea.hbm %s2478_s8, %s1140_s12  ;;  %s2428_s21 = int_to_ptr.vmem [resolvable:$true] %s986_s21 }
  0xd1   : > { %1457 = vmatpush3.bf16.msra.mxu0 %v1456_v5  ;;  %v504_v11 = vld [vmem:[#allocation7 + $0x8] sm:$0xff]  ;;  %v506_v13 = vld [vmem:[#allocation7 + $0x18] sm:$0xff]  ;;  %v1462_v14 = vpack.c.bf16 %v414_v9, %v413_v8  ;;  %v415_v16 = vld [vmem:[#allocation5 + $0x30] sm:$0xff]  ;;  %s973_s13 = scalar_lea.sflag [#allocation4], %s2317_s1  ;;  %s1909_s10 = scalar_lea.vmem %s2428_s21, 128 }
  0xd2   : > { %1458 = vmatprep.subr.bf16.mxu0 %v1998_v0  ;;  %v1480_v15 = vpack.c.bf16 %v504_v11, %v503_v10  ;;  %v416_v17 = vld [vmem:[#allocation5 + $0x38] sm:$0xff]  ;;  %v1483_v18 = vpack.c.bf16 %v506_v13, %v505_v12  ;;  %v507_v19 = vld [vmem:[#allocation7 + $0x20] sm:$0xff]  ;;  %v508_v20 = vld [vmem:[#allocation7 + $0x28] sm:$0xff]  ;;  %p1910_p6 = scmp.ne.s32.totalorder %s2428_s21, %s1909_s10  ;;  %p2500_p9 = scmp.ne.s32.totalorder %s2490_s16, 0 }
  0xd3   : > { %v1465_v21 = vpack.c.bf16 %v416_v17, %v415_v16  ;;  %v417_v22 = vld [vmem:[#allocation5 + $0x40] sm:$0xff]  ;;  %v418_v23 = vld [vmem:[#allocation5 + $0x48] sm:$0xff]  ;;  %v1486_v24 = vpack.c.bf16 %v508_v20, %v507_v19  ;;  %v509_v25 = vld [vmem:[#allocation7 + $0x30] sm:$0xff]  ;;  %s2001_s11 = smov [#allocation14]  }
  0xd4   : > { %1481 = vmatpush3.bf16.msra.mxu1 %v1480_v15  ;;  %v510_v26 = vld [vmem:[#allocation7 + $0x38] sm:$0xff]  ;;  %v1468_v27 = vpack.c.bf16 %v418_v23, %v417_v22  ;;  %v419_v28 = vld [vmem:[#allocation5 + $0x50] sm:$0xff]  ;;  %v511_v31 = vld [vmem:[#allocation7 + $0x40] sm:$0xff]  ;;  %p1911_p12 = pnand %p1910_p6, %p2500_p9  ;;  %s1913_s26 = sshll.u32 %s2001_s11, 4  ;;  %s1914_s26 = int_to_ptr.vmem [resolvable:$false] %s1913_s26 }
  0xd5   : > { %1460 = vmatpush3.bf16.msra.mxu0 %v1459_v7  ;;  %1482 = vmatprep.subr.bf16.mxu1 %v1998_v0  ;;  %v420_v29 = vld [vmem:[#allocation5 + $0x58] sm:$0xff]  ;;  %v1489_v30 = vpack.c.bf16 %v510_v26, %v509_v25  ;;  %v512_v32 = vld [vmem:[#allocation7 + $0x48] sm:$0xff]  ;;  %v421_v34 = vld [vmem:[#allocation5 + $0x60] sm:$0xff]  ;;  %s1915_s24 = scalar_lea.vmem %s1914_s26, 256  ;;  %p1916_p13 = scmp.lt.s32.totalorder %s2428_s21, %s1914_s26 }
  0xd6   : > { %1461 = vmatprep.subr.bf16.mxu0 %v1998_v0  ;;  %v1471_v33 = vpack.c.bf16 %v420_v29, %v419_v28  ;;  %v422_v35 = vld [vmem:[#allocation5 + $0x68] sm:$0xff]  ;;  %v1492_v36 = vpack.c.bf16 %v512_v32, %v511_v31  ;;  %v513_v37 = vld [vmem:[#allocation7 + $0x50] sm:$0xff]  ;;  %v514_v38 = vld [vmem:[#allocation7 + $0x58] sm:$0xff]  ;;  %p1912_p1 = pneg %p1911_p12  ;;  %p1917_p0 = scmp.lt.s32.totalorder %s1915_s24, %s1909_s10 }
  0xd7   : > { %v1474_v39 = vpack.c.bf16 %v422_v35, %v421_v34  ;;  %v423_v40 = vld [vmem:[#allocation5 + $0x70] sm:$0xff]  ;;  %v424_v41 = vld [vmem:[#allocation5 + $0x78] sm:$0xff]  ;;  %v1495_v42 = vpack.c.bf16 %v514_v38, %v513_v37  ;;  %v515_v43 = vld [vmem:[#allocation7 + $0x60] sm:$0xff] }
  0xd8   : > { %1484 = vmatpush3.bf16.msra.mxu1 %v1483_v18  ;;  %v516_v44 = vld [vmem:[#allocation7 + $0x68] sm:$0xff]  ;;  %v1477_v45 = vpack.c.bf16 %v424_v41, %v423_v40  ;;  %v408_v47 = vld [vmem:[%s2323_s14] sm:$0xff]  ;;  %v597_v51 = vld [vmem:[#allocation8] sm:$0xff]  ;;  %p1918_p2 = por %p1917_p0, %p1916_p13 }
  0xd9   : > { %1463 = vmatpush3.bf16.msra.mxu0 %v1462_v14  ;;  %1485 = vmatprep.subr.bf16.mxu1 %v1998_v0  ;;  %v1498_v46 = vpack.c.bf16 %v516_v44, %v515_v43  ;;  %v517_v48 = vld [vmem:[#allocation7 + $0x70] sm:$0xff]  ;;  %v518_v49 = vld [vmem:[#allocation7 + $0x78] sm:$0xff]  ;;  %v598_v52 = vld [vmem:[#allocation8 + $0x8] sm:$0xff] }
  0xda   : > { %1464 = vmatprep.subr.bf16.mxu0 %v1998_v0  ;;  %v1501_v50 = vpack.c.bf16 %v518_v49, %v517_v48  ;;  %v599_v53 = vld [vmem:[#allocation8 + $0x10] sm:$0xff]  ;;  %v1504_v54 = vpack.c.bf16 %v598_v52, %v597_v51  ;;  %v600_v55 = vld [vmem:[#allocation8 + $0x18] sm:$0xff]  ;;  %v601_v57 = vld [vmem:[#allocation8 + $0x20] sm:$0xff]  ;;  %p1919_p3 = pnand %p1918_p2, %p1912_p1 }
  0xdb   : > { %v1507_v56 = vpack.c.bf16 %v600_v55, %v599_v53  ;;  %v602_v58 = vld [vmem:[#allocation8 + $0x28] sm:$0xff]  ;;  %v603_v60 = vld [vmem:[#allocation8 + $0x30] sm:$0xff]  ;;  %v604_v61 = vld [vmem:[#allocation8 + $0x38] sm:$0xff] }
  0xdc   : > { %1487 = vmatpush3.bf16.msra.mxu1 %v1486_v24  ;;  %v1510_v59 = vpack.c.bf16 %v602_v58, %v601_v57  ;;  %v1513_v62 = vpack.c.bf16 %v604_v61, %v603_v60  ;;  %v605_v63 = vld [vmem:[#allocation8 + $0x40] sm:$0xff]  ;;  %v606_v2 = vld [vmem:[#allocation8 + $0x48] sm:$0xff]  ;;  %v607_v4 = vld [vmem:[#allocation8 + $0x50] sm:$0xff] }
  0xdd   : > { %1466 = vmatpush3.bf16.msra.mxu0 %v1465_v21  ;;  %1488 = vmatprep.subr.bf16.mxu1 %v1998_v0  ;;  %v1516_v3 = vpack.c.bf16 %v606_v2, %v605_v63  ;;  %v608_v5 = vld [vmem:[#allocation8 + $0x58] sm:$0xff]  ;;  %v609_v7 = vld [vmem:[#allocation8 + $0x60] sm:$0xff]  ;;  %v610_v8 = vld [vmem:[#allocation8 + $0x68] sm:$0xff] }
  0xde   : > { %1467 = vmatprep.subr.bf16.mxu0 %v1998_v0  ;;  %v1519_v6 = vpack.c.bf16 %v608_v5, %v607_v4  ;;  %v1522_v9 = vpack.c.bf16 %v610_v8, %v609_v7  ;;  %v1133_v10 = vld [vmem:[%s2477_s7] ss:$0 sm:$0xff]  ;;  %v612_v16 = vld [vmem:[#allocation8 + $0x78] sm:$0xff]  ;;  %v690_v18 = vld [vmem:[#allocation10] sm:$0xff] }
  0xdf   : > { %v611_v15 = vld [vmem:[#allocation8 + $0x70] sm:$0xff]  ;;  %v691_v19 = vld [vmem:[#allocation10 + $0x8] sm:$0xff]  ;;  %v693_v22 = vld [vmem:[#allocation10 + $0x18] sm:$0xff] }
  0xe0   : > { %1490 = vmatpush3.bf16.msra.mxu1 %v1489_v30  ;;  %v1525_v17 = vpack.c.bf16 %v612_v16, %v611_v15  ;;  %v692_v20 = vld [vmem:[#allocation10 + $0x10] sm:$0xff]  ;;  %v1528_v21 = vpack.c.bf16 %v691_v19, %v690_v18  ;;  %v694_v24 = vld [vmem:[#allocation10 + $0x20] sm:$0xff]  ;;  %v695_v25 = vld [vmem:[#allocation10 + $0x28] sm:$0xff] }
  0xe1   : > { %1469 = vmatpush3.bf16.msra.mxu0 %v1468_v27  ;;  %1491 = vmatprep.subr.bf16.mxu1 %v1998_v0  ;;  %v1531_v23 = vpack.c.bf16 %v693_v22, %v692_v20  ;;  %v1534_v26 = vpack.c.bf16 %v695_v25, %v694_v24  ;;  %v696_v27 = vld [vmem:[#allocation10 + $0x30] sm:$0xff]  ;;  %v697_v28 = vld [vmem:[#allocation10 + $0x38] sm:$0xff]  ;;  %v698_v30 = vld [vmem:[#allocation10 + $0x40] sm:$0xff] }
  0xe2   : > { %1470 = vmatprep.subr.bf16.mxu0 %v1998_v0  ;;  %v1537_v29 = vpack.c.bf16 %v697_v28, %v696_v27  ;;  %v699_v31 = vld [vmem:[#allocation10 + $0x48] sm:$0xff]  ;;  %v701_v34 = vld [vmem:[#allocation10 + $0x58] sm:$0xff]  ;;  %v704_v44 = vld [vmem:[#allocation10 + $0x70] sm:$0xff] }
  0xe3   : > { %v1540_v32 = vpack.c.bf16 %v699_v31, %v698_v30  ;;  %v703_v37 = vld [vmem:[#allocation10 + $0x68] sm:$0xff]  ;;  %v786_v49 = vld [vmem:[#allocation11 + $0x10] sm:$0xff]  ;;  %v787_v51 = vld [vmem:[#allocation11 + $0x18] sm:$0xff] }
  0xe4   : > { %1493 = vmatpush3.bf16.msra.mxu1 %v1492_v36  ;;  %v702_v36 = vld [vmem:[#allocation10 + $0x60] sm:$0xff]  ;;  %v785_v48 = vld [vmem:[#allocation11 + $0x8] sm:$0xff]  ;;  %v1555_v52 = vpack.c.bf16 %v787_v51, %v786_v49  ;;  %v791_v57 = vld [vmem:[#allocation11 + $0x38] sm:$0xff] }
  0xe5   : > { %1472 = vmatpush3.bf16.msra.mxu0 %v1471_v33  ;;  %1494 = vmatprep.subr.bf16.mxu1 %v1998_v0  ;;  %v700_v33 = vld [vmem:[#allocation10 + $0x50] sm:$0xff]  ;;  %v1546_v38 = vpack.c.bf16 %v703_v37, %v702_v36  ;;  %v788_v53 = vld [vmem:[#allocation11 + $0x20] sm:$0xff]  ;;  %v793_v60 = vld [vmem:[#allocation11 + $0x48] sm:$0xff] }
  0xe6   : > { %1473 = vmatprep.subr.bf16.mxu0 %v1998_v0  ;;  %v1543_v35 = vpack.c.bf16 %v701_v34, %v700_v33  ;;  %v795_v63 = vld [vmem:[#allocation11 + $0x58] sm:$0xff]  ;;  %v797_v4 = vld [vmem:[#allocation11 + $0x68] sm:$0xff]  ;;  %v880_v15 = vld [vmem:[#allocation13 + $0x10] sm:$0xff] }
  0xe7   : > { %v882_v19 = vld [vmem:[#allocation13 + $0x20] sm:$0xff]  ;;  %v883_v20 = vld [vmem:[#allocation13 + $0x28] sm:$0xff]  ;;  %v885_v22 = vld [vmem:[#allocation13 + $0x38] sm:$0xff] }
  0xe8   : > { %1496 = vmatpush3.bf16.msra.mxu1 %v1495_v42  ;;  %v886_v24 = vld [vmem:[#allocation13 + $0x40] sm:$0xff]  ;;  %v887_v25 = vld [vmem:[#allocation13 + $0x48] sm:$0xff]  ;;  %v888_v27 = vld [vmem:[#allocation13 + $0x50] sm:$0xff] }
  0xe9   : > { %1475 = vmatpush3.bf16.msra.mxu0 %v1474_v39  ;;  %1497 = vmatprep.subr.bf16.mxu1 %v1998_v0  ;;  %v1134_v39 = vld [vmem:[%s2477_s7 + $0x1] ss:$0 sm:$0xff]  ;;  %v889_v28 = vld [vmem:[#allocation13 + $0x58] sm:$0xff]  ;;  %v890_v30 = vld [vmem:[#allocation13 + $0x60] sm:$0xff] }
  0xea   : > { %1476 = vmatprep.subr.bf16.mxu0 %v1998_v0  ;;  %v891_v31 = vld [vmem:[#allocation13 + $0x68] sm:$0xff]  ;;  %v1136_v33 = vld [vmem:[%s2477_s7 + $0x3] ss:$0 sm:$0xff] }
  0xec   : > { %1499 = vmatpush3.bf16.msra.mxu1 %v1498_v46 }
  0xed   : > { %1478 = vmatpush3.bf16.msra.mxu0 %v1477_v45  ;;  %1500 = vmatprep.subr.bf16.mxu1 %v1998_v0  ;;  %v705_v45 = vld [vmem:[#allocation10 + $0x78] sm:$0xff] }
  0xee   : > { %1503 = vmatprep.subr.bf16.mxu0 %v1998_v0  ;;  %v1549_v46 = vpack.c.bf16 %v705_v45, %v704_v44  ;;  %v1138_v45 = vld [vmem:[%s2477_s7 + $0x5] ss:$0 sm:$0xff] }
  0xf0   : > { %1278 = vmatmul.mubr.f32.vlgmr.msra.gmra.mrb[0].mxu0 %v408_v47  ;;  %1502 = vmatpush3.bf16.msra.mxu1 %v1501_v50  ;;  %v784_v47 = vld [vmem:[#allocation11] sm:$0xff] }
  0xf1   : > { %1347 = vmatprep.mubr.msk.f32.mxu0 %vm1999_vm0, %v2000_v1  ;;  %1527 = vmatprep.subr.bf16.mxu1 %v1998_v0  ;;  %v1552_v50 = vpack.c.bf16 %v785_v48, %v784_v47 }
  0xf2   : > { %1505 = vmatpush3.bf16.msra.mxu0 %v1504_v54  ;;  %v789_v54 = vld [vmem:[#allocation11 + $0x28] sm:$0xff] }
  0xf3   : > { %1506 = vmatprep.subr.bf16.mxu0 %v1998_v0  ;;  %v1558_v55 = vpack.c.bf16 %v789_v54, %v788_v53 }
  0xf6   : > { %1508 = vmatpush3.bf16.msra.mxu0 %v1507_v56  ;;  %v790_v56 = vld [vmem:[#allocation11 + $0x30] sm:$0xff] }
  0xf7   : > { %1509 = vmatprep.subr.bf16.mxu0 %v1998_v0  ;;  %v1561_v58 = vpack.c.bf16 %v791_v57, %v790_v56 }
  0xfa   : > { %1511 = vmatpush3.bf16.msra.mxu0 %v1510_v59  ;;  %v792_v59 = vld [vmem:[#allocation11 + $0x40] sm:$0xff] }
  0xfb   : > { %1512 = vmatprep.subr.bf16.mxu0 %v1998_v0  ;;  %v1564_v61 = vpack.c.bf16 %v793_v60, %v792_v59 }
  0xfe   : > { %1514 = vmatpush3.bf16.msra.mxu0 %v1513_v62  ;;  %v794_v62 = vld [vmem:[#allocation11 + $0x50] sm:$0xff] }
  0xff   : > { %1515 = vmatprep.subr.bf16.mxu0 %v1998_v0  ;;  %v1567_v2 = vpack.c.bf16 %v795_v63, %v794_v62 }
 0x102   : > { %1517 = vmatpush3.bf16.msra.mxu0 %v1516_v3  ;;  %v796_v3 = vld [vmem:[#allocation11 + $0x60] sm:$0xff] }
 0x103   : > { %1518 = vmatprep.subr.bf16.mxu0 %v1998_v0  ;;  %v1570_v5 = vpack.c.bf16 %v797_v4, %v796_v3 }
 0x106   : > { %1520 = vmatpush3.bf16.msra.mxu0 %v1519_v6  ;;  %v1135_v6 = vld [vmem:[%s2477_s7 + $0x2] ss:$0 sm:$0xff] }
 0x107   : > { %1521 = vmatprep.subr.bf16.mxu0 %v1998_v0 }
 0x10a   : > { %1523 = vmatpush3.bf16.msra.mxu0 %v1522_v9 }
 0x10b   : > { %1524 = vmatprep.subr.bf16.mxu0 %v1998_v0 }
 0x10e   : > { %1526 = vmatpush3.bf16.msra.mxu0 %v1525_v17  ;;  %v881_v17 = vld [vmem:[#allocation13 + $0x18] sm:$0xff] }
 0x10f   : > { %1551 = vmatprep.subr.bf16.mxu0 %v1998_v0  ;;  %v1579_v18 = vpack.c.bf16 %v881_v17, %v880_v15 }
 0x1c3   : > { %v498_v11 = vpop.f32.mrb[0].mxu0 }
 0x1c4   : > { %v499_v12 = vadd.f32 %v1133_v10, %v498_v11  ;;  %v1279_v13 = vpop.f32.mrb[1].mxu0  ;;  %v798_v10 = vld [vmem:[#allocation11 + $0x70] sm:$0xff]  ;;  %v799_v11 = vld [vmem:[#allocation11 + $0x78] sm:$0xff] }
 0x1c5   : > { %v878_v13 = vld [vmem:[#allocation13] sm:$0xff] }
 0x1c6   : > { %v502_v14 = vmax.f32 %v499_v12, 0.0  ;;  %v1573_v12 = vpack.c.bf16 %v799_v11, %v798_v10 }
 0x1c8   : > { %1313 = vmatmul.mubr.f32.vlgmr.msra.gmra.mrb[0].mxu1 %v502_v14  ;;  %v879_v14 = vld [vmem:[#allocation13 + $0x8] sm:$0xff] }
 0x1c9   : > { %1382 = vmatprep.mubr.msk.f32.mxu1 %vm1999_vm0, %v2000_v1  ;;  %1529 = vmatpush3.bf16.msra.mxu1 %v1528_v21  ;;  %v1576_v16 = vpack.c.bf16 %v879_v14, %v878_v13  ;;  %v1582_v21 = vpack.c.bf16 %v883_v20, %v882_v19 }
 0x1ca   : > { %1530 = vmatprep.subr.bf16.mxu1 %v1998_v0 }
 0x1cd   : > { %1532 = vmatpush3.bf16.msra.mxu1 %v1531_v23 }
 0x1ce   : > { %1533 = vmatprep.subr.bf16.mxu1 %v1998_v0 }
 0x1d1   : > { %1535 = vmatpush3.bf16.msra.mxu1 %v1534_v26  ;;  %v1588_v26 = vpack.c.bf16 %v887_v25, %v886_v24 }
 0x1d2   : > { %1536 = vmatprep.subr.bf16.mxu1 %v1998_v0 }
 0x1d5   : > { %1538 = vmatpush3.bf16.msra.mxu1 %v1537_v29  ;;  %v1591_v29 = vpack.c.bf16 %v889_v28, %v888_v27 }
 0x1d6   : > { %1539 = vmatprep.subr.bf16.mxu1 %v1998_v0 }
 0x1d9   : > { %1541 = vmatpush3.bf16.msra.mxu1 %v1540_v32  ;;  %v1594_v32 = vpack.c.bf16 %v891_v31, %v890_v30 }
 0x1da   : > { %1542 = vmatprep.subr.bf16.mxu1 %v1998_v0 }
 0x1dd   : > { %1544 = vmatpush3.bf16.msra.mxu1 %v1543_v35 }
 0x1de   : > { %1545 = vmatprep.subr.bf16.mxu1 %v1998_v0 }
 0x1e1   : > { %1547 = vmatpush3.bf16.msra.mxu1 %v1546_v38  ;;  %v892_v38 = vld [vmem:[#allocation13 + $0x70] sm:$0xff] }
 0x1e2   : > { %1548 = vmatprep.subr.bf16.mxu1 %v1998_v0 }
 0x1e5   : > { %1550 = vmatpush3.bf16.msra.mxu1 %v1549_v46 }
 0x1e6   : > { %1575 = vmatprep.subr.bf16.mxu1 %v1998_v0 }
 0x29b   : > { %v592_v40 = vpop.f32.mrb[0].mxu1 }
 0x29c   : > { %v593_v41 = vadd.f32 %v1134_v39, %v592_v40  ;;  %v1314_v42 = vpop.f32.mrb[1].mxu1  ;;  %v893_v39 = vld [vmem:[#allocation13 + $0x78] sm:$0xff] }
 0x29d   : > { %v1597_v40 = vpack.c.bf16 %v893_v39, %v892_v38 }
 0x29e   : > { %v596_v43 = vmax.f32 %v593_v41, 0.0  ;;  %v1137_v41 = vld [vmem:[%s2477_s7 + $0x4] ss:$0 sm:$0xff] }
 0x2a0   : > { %1348 = vmatmul.mubr.f32.vlgmr.msra.gmra.mrb[2].mxu0 %v596_v43 }
 0x2a1   : > { %1417 = vmatprep.mubr.msk.f32.mxu0 %vm1999_vm0, %v2000_v1  ;;  %1553 = vmatpush3.bf16.msra.mxu0 %v1552_v50 }
 0x2a2   : > { %1554 = vmatprep.subr.bf16.mxu0 %v1998_v0 }
 0x2a5   : > { %1556 = vmatpush3.bf16.msra.mxu0 %v1555_v52 }
 0x2a6   : > { %1557 = vmatprep.subr.bf16.mxu0 %v1998_v0 }
 0x2a9   : > { %1559 = vmatpush3.bf16.msra.mxu0 %v1558_v55 }
 0x2aa   : > { %1560 = vmatprep.subr.bf16.mxu0 %v1998_v0 }
 0x2ad   : > { %1562 = vmatpush3.bf16.msra.mxu0 %v1561_v58 }
 0x2ae   : > { %1563 = vmatprep.subr.bf16.mxu0 %v1998_v0 }
 0x2b1   : > { %1565 = vmatpush3.bf16.msra.mxu0 %v1564_v61 }
 0x2b2   : > { %1566 = vmatprep.subr.bf16.mxu0 %v1998_v0 }
 0x2b5   : > { %1568 = vmatpush3.bf16.msra.mxu0 %v1567_v2 }
 0x2b6   : > { %1569 = vmatprep.subr.bf16.mxu0 %v1998_v0 }
 0x2b9   : > { %1571 = vmatpush3.bf16.msra.mxu0 %v1570_v5 }
 0x2ba   : > { %1572 = vmatprep.subr.bf16.mxu0 %v1998_v0 }
 0x2bd   : > { %1574 = vmatpush3.bf16.msra.mxu0 %v1573_v12 }
 0x373   : > { %v686_v7 = vpop.f32.mrb[2].mxu0 }
 0x374   : > { %v687_v8 = vadd.f32 %v1135_v6, %v686_v7  ;;  %v1349_v9 = vpop.f32.mrb[3].mxu0 }
 0x376   : > { %1383 = vmatmul.mubr.f32.vlgmr.msra.gmra.mrb[2].mxu1 %v687_v8 }
 0x377   : > { %1452 = vmatprep.mubr.msk.f32.mxu1 %vm1999_vm0, %v2000_v1  ;;  %1577 = vmatpush3.bf16.msra.mxu1 %v1576_v16  ;;  %v884_v1 = vld [vmem:[#allocation13 + $0x30] sm:$0xff] }
 0x378   : > { %1578 = vmatprep.subr.bf16.mxu1 %v1998_v0  ;;  %v1585_v23 = vpack.c.bf16 %v885_v22, %v884_v1 }
 0x37b   : > { %1580 = vmatpush3.bf16.msra.mxu1 %v1579_v18 }
 0x37c   : > { %1581 = vmatprep.subr.bf16.mxu1 %v1998_v0 }
 0x37f   : > { %1583 = vmatpush3.bf16.msra.mxu1 %v1582_v21 }
 0x380   : > { %1584 = vmatprep.subr.bf16.mxu1 %v1998_v0 }
 0x383   : > { %1586 = vmatpush3.bf16.msra.mxu1 %v1585_v23 }
 0x384   : > { %1587 = vmatprep.subr.bf16.mxu1 %v1998_v0 }
 0x387   : > { %1589 = vmatpush3.bf16.msra.mxu1 %v1588_v26 }
 0x388   : > { %1590 = vmatprep.subr.bf16.mxu1 %v1998_v0 }
 0x38b   : > { %1592 = vmatpush3.bf16.msra.mxu1 %v1591_v29 }
 0x38c   : > { %1593 = vmatprep.subr.bf16.mxu1 %v1998_v0 }
 0x38f   : > { %1595 = vmatpush3.bf16.msra.mxu1 %v1594_v32 }
 0x390   : > { %1596 = vmatprep.subr.bf16.mxu1 %v1998_v0 }
 0x393   : > { %1598 = vmatpush3.bf16.msra.mxu1 %v1597_v40 }
 0x449   : > { %v779_v34 = vpop.f32.mrb[2].mxu1 }
 0x44a   : > { %v780_v35 = vadd.f32 %v1136_v33, %v779_v34  ;;  %v1384_v36 = vpop.f32.mrb[3].mxu1 }
 0x44c   : > { %v783_v37 = vmax.f32 %v780_v35, 0.0 }
 0x44e   : > { %1418 = vmatmul.mubr.f32.vlgmr.msra.gmra.mrb[4].mxu0 %v783_v37 }
 0x521   : > { %v873_v0 = vpop.f32.mrb[4].mxu0 }
 0x522   : > { %v874_v42 = vadd.f32 %v1137_v41, %v873_v0  ;;  %v1419_v43 = vpop.f32.mrb[5].mxu0 }
 0x524   : > { %v877_v44 = vmax.f32 %v874_v42, 0.0 }
 0x526   : > { %1453 = vmatmul.mubr.f32.vlgmr.msra.gmra.mrb[4].mxu1 %v877_v44 }
 0x5f9   : > { %v967_v46 = vpop.f32.mrb[4].mxu1 }
 0x5fa   : > { %v968_v47 = vadd.f32 %v1138_v45, %v967_v46  ;;  %v1454_v48 = vpop.f32.mrb[5].mxu1 }
 0x5fc   : > { %971 = vst [vmem:[%s407_s9] sm:$0xff] %v968_v47 }
 0x5fd   : > { %1922 = shalt.err (!%p1919_p3)
}
 0x5fe   : > { %s1923_s1 = scalar_lea.hbm %s2426_s17, 128  ;;  %s1927_s14 = scalar_lea.hbm %s2478_s8, 256 }
 0x5ff   : > { %p1924_p4 = scmp.ne.s32.totalorder %s2426_s17, %s1923_s1  ;;  %p1928_p8 = scmp.lt.u32.totalorder %s2426_s17, %s2478_s8 }
 0x600   : > { %p1929_p5 = scmp.lt.u32.totalorder %s1927_s14, %s1923_s1  ;;  %p1931_p6 = scmp.lt.u32.totalorder %s1923_s1, %s2426_s17 }
 0x601   : > { %p1925_p10 = pnand %p1924_p4, %p2500_p9 }
 0x602   : > { %p1930_p7 = por %p1929_p5, %p1928_p8 }
 0x603   : > { %p1926_p11 = pneg %p1925_p10 }
 0x604   : > { %p1932_p12 = por %p1931_p6, %p1930_p7 }
 0x606   : > { %p1933_p1 = pnand %p1932_p12, %p1926_p11 }
 0x608   : > { %1936 = shalt.err (!%p1933_p1)
}
 0x609   : > { %1625 = dma.vmem_to_hbm [thread:$0]  (%p2500_p9), %s2428_s21, 128, %s2426_s17, %s973_s13  }
 0x60a PF: > { %s998_s19 = sand.u32 1, %s1975_s27   ;;  %p2501_p13 = scmp.ne.s32.totalorder %s2491_s22, 0 }
 0x60b   : > { %p2502_p0 = scmp.ge.s32.totalorder %s1987_s30, 2  ;;  %s999_s15 = scalar_lea.sflag [#allocation4], %s998_s19 }
 0x60d   : > { %p1651_p2 = pnand %p2502_p0, %p2501_p13 }
 0x60f   : > { %1970 = dma.done.wait (!%p1651_p2), %s999_s15, 128  }
 0x610   : > { %1972 = vsyncadd (!%p1651_p2), %s999_s15, 4294967168  ;;  %p24_p3 = scmp.ge.s32.totalorder %s2241_s23, 4   ;;  %s2503_s27 = smov %s1979_s28 }
 0x611   : > { %s2504_s28 = smov %s1983_s29  ;;  %s2505_s29 = smov %s2252_s18 }
 0x612   : > { %s2506_s30 = smov %s2241_s23  ;;  %26 = sbr.rel (!%p24_p3) target bundleno = 10 (0xa), region = 121 }
 0x619   :  { %1004 = vsyncpa [#allocation3], 1 }
 0x61a   :  { %1006 = vsyncpa [#allocation3 + $0x1], 1 }
 0x61b   :  { %1007 = vsyncpa [#allocation6], 1 }
 0x61c   :  { %1008 = vsyncpa [#allocation9], 1 }
 0x61d   :  { %1009 = vsyncpa [#allocation12], 1 }
 0x61e   :  { %1010 = vsyncpa [#allocation4], 1 }
 0x61f   :  { %1012 = vsyncpa [#allocation4 + $0x1], 1 }

</bundles_post_ra>
